<compile_context>
chip_gen: v6e
topology: v6e:2x2x1
jax: 0.10.0
libtpu: 0.0.40
codegen_flags: <defaults>
</compile_context>

<pallas_src>
import functools

import jax
import jax.numpy as jnp
from jax.experimental import pallas as pl
from jax.experimental.pallas import tpu as pltpu


# ----------------------------- kernel helpers -------------------------------

def _layernorm(x, w, b, eps):
    # torch.nn.LayerNorm: biased variance over the last dim, f32 throughout.
    mu = jnp.mean(x, axis=-1, keepdims=True)
    var = jnp.mean((x - mu) ** 2, axis=-1, keepdims=True)
    return (x - mu) * jax.lax.rsqrt(var + eps) * w + b


def _gelu_tanh(x):
    # torch.nn.functional.gelu(approximate='tanh'), f32.
    c = 0.7978845608028654  # sqrt(2/pi)
    return 0.5 * x * (1.0 + jnp.tanh(c * (x + 0.044715 * x * x * x)))


def _spec(block_shape, index_map, *, single_buffer=False):
    """BlockSpec; grid-invariant operands request single buffering."""
    if single_buffer and hasattr(pl, "Buffered"):
        try:
            return pl.BlockSpec(block_shape, index_map,
                                pipeline_mode=pl.Buffered(1))
        except TypeError:  # older jax without pipeline_mode -> default (2x)
            pass
    return pl.BlockSpec(block_shape, index_map)


def _vmem_limit(est_bytes):
    # Size the scoped-VMEM limit from the actual chip capacity (v5e/v6e have
    # 128 MiB physical; v7x 64 MiB) instead of a hard-coded clamp.
    try:
        cap = int(pltpu.get_tpu_info().vmem_capacity_bytes)
    except Exception:
        cap = 64 << 20
    hi = max(16 << 20, int(cap * 9 / 10))
    return int(min(max(int(est_bytes) + (4 << 20), 16 << 20), hi))


# --------------------------------- kernels -----------------------------------

def _ln_qkv_kernel(x_ref, ln1w, ln1b, wqkv, bqkv, q_ref, k_ref, v_ref,
                   *, eps, d):
    x = x_ref[0]                                             # (TQ, D) f32
    h = _layernorm(x, ln1w[0], ln1b[0], eps).astype(jnp.bfloat16)
    # One fused bf16 matmul (D,3D), f32 accumulation.  Attention scale is
    # already folded into the Q slab of wqkv/bqkv by the wrapper.
    qkv = jnp.dot(h, wqkv[...], preferred_element_type=jnp.float32) + bqkv[0]
    q_ref[0] = qkv[:, :d].astype(q_ref.dtype)
    k_ref[0] = qkv[:, d:2 * d].astype(k_ref.dtype)
    v_ref[0] = qkv[:, 2 * d:].astype(v_ref.dtype)


def _attn_mlp_kernel(x_ref, q_ref, k_ref, v_ref, wo, bo, ln2w, ln2b,
                     w1, b1, w2, b2, o_ref, hmid_ref, acc_ref,
                     *, eps, num_heads, seq_real):
    ic = pl.program_id(2)

    # ---- attention + residual-1 + LN2: once per (b, q-tile) -----------------
    @pl.when(ic == 0)
    def _attention():
        x = x_ref[0]                       # (TQ, D)    f32 residual stream
        q = q_ref[0]                       # (TQ, D)    bf16 (scale folded in)
        k = k_ref[0]                       # (S_pad, D) bf16
        v = v_ref[0]                       # (S_pad, D) bf16
        tq, d = x.shape
        s_pad = k.shape[0]
        hd = d // num_heads

        need_mask = s_pad > seq_real
        if need_mask:
            key_idx = jax.lax.broadcasted_iota(jnp.int32, (tq, s_pad), 1)

        # Per-head loop with static lane slices: each head's f32 score /
        # softmax tensors are live only within its own iteration.
        ctx_heads = []
        for h in range(num_heads):
            sl = slice(h * hd, (h + 1) * hd)
            s = jax.lax.dot_general(q[:, sl], k[:, sl],
                                    (((1,), (1,)), ((), ())),
                                    preferred_element_type=jnp.float32)
            if need_mask:
                s = jnp.where(key_idx < seq_real, s, jnp.float32(-1e30))
            # Exact f32 softmax (matches torch softmax(dtype=float32)).
            s = s - jnp.max(s, axis=-1, keepdims=True)
            e = jnp.exp(s)
            p = e / jnp.sum(e, axis=-1, keepdims=True)
            ctx_heads.append(jnp.dot(p.astype(jnp.bfloat16), v[:, sl],
                                     preferred_element_type=jnp.float32))

        # Single out-projection matmul on the lane concat of the heads.
        ctx = jnp.concatenate(ctx_heads, axis=-1)            # (TQ, D) f32
        attn = jnp.dot(ctx.astype(jnp.bfloat16), wo[...],
                       preferred_element_type=jnp.float32) + bo[0]

        res = x + attn                                       # residual 1 (f32)
        hmid_ref[...] = _layernorm(res, ln2w[0], ln2b[0],
                                   eps).astype(jnp.bfloat16)
        acc_ref[...] = res + b2[0]          # residual-2 base + fc2 bias (f32)

    # ---- MLP streamed over intermediate-dim chunks ---------------------------
    hm = hmid_ref[...]                                       # (TQ, D) bf16
    t = jnp.dot(hm, w1[...], preferred_element_type=jnp.float32) + b1[0]
    t = _gelu_tanh(t).astype(jnp.bfloat16)
    acc_ref[...] += jnp.dot(t, w2[...], preferred_element_type=jnp.float32)

    @pl.when(ic == pl.num_programs(2) - 1)
    def _finalize():
        o_ref[0] = acc_ref[...].astype(o_ref.dtype)          # residual 2


# --------------------------------- wrapper ------------------------------------

def siglip_encoder_layer(x, p, *, num_heads, eps, tq=256, mlp_chunk=512):
    B, S, D = x.shape
    H = num_heads
    hd = D // H
    scale = float(hd) ** (-0.5)
    I = p["w1"].shape[1]

    bf16, f32 = jnp.bfloat16, jnp.float32

    # ---- sequence tiling: pad S so the query tile divides it -----------------
    tq = max(8, (int(tq) // 8) * 8)
    if S <= tq:
        tq, s_pad = S, S                    # single tile == full (padded) dim
    else:
        s_pad = pl.cdiv(S, tq) * tq
    n_q = s_pad // tq
    # TODO(synk): on v7x at B=1 pad further so n_q is even (both TensorCores).

    # ---- MLP intermediate-dim streaming ---------------------------------------
    mlp_chunk = max(128, (int(mlp_chunk) // 128) * 128)
    if I <= mlp_chunk:
        ti, i_pad = I, I
    else:
        ti = mlp_chunk
        i_pad = pl.cdiv(I, ti) * ti
    n_i = i_pad // ti

    xp = x if s_pad == S else jnp.pad(x, ((0, 0), (0, s_pad - S), (0, 0)))

    # Fused QKV weight/bias, attention scale folded into the Q slab.
    wqkv = jnp.concatenate([p["wq"] * scale, p["wk"], p["wv"]],
                           axis=1).astype(bf16)
    bqkv = jnp.concatenate([p["bq"] * scale, p["bk"], p["bv"]],
                           axis=1).astype(f32)
    wo = p["wo"].astype(bf16)
    w1, b1, w2 = p["w1"], p["b1"], p["w2"]
    if i_pad != I:
        # Zero-pad the intermediate dim; padded columns/rows contribute zero.
        w1 = jnp.pad(w1, ((0, 0), (0, i_pad - I)))
        b1 = jnp.pad(b1, ((0, 0), (0, i_pad - I)))
        w2 = jnp.pad(w2, ((0, i_pad - I), (0, 0)))
    w1 = w1.astype(bf16)
    w2 = w2.astype(bf16)

    # ---- kernel 1: LayerNorm1 + fused QKV projection --------------------------
    xtile1 = pl.BlockSpec((1, tq, D), lambda b, qi: (b, qi, 0))
    row1 = lambda n: _spec((1, n), lambda b, qi: (0, 0), single_buffer=True)

    k1_est = (2 * tq * D * 4 + 2 * 3 * tq * D * 2      # x tile + 3 out tiles
              + D * 3 * D * 2 + 3 * D * 4 + 2 * D * 4  # fused weights/biases
              + 2 * tq * 3 * D * 4)                    # live qkv f32
    q, k, v = pl.pallas_call(
        functools.partial(_ln_qkv_kernel, eps=eps, d=D),
        out_shape=(jax.ShapeDtypeStruct((B, s_pad, D), bf16),) * 3,
        grid_spec=pltpu.PrefetchScalarGridSpec(
            num_scalar_prefetch=0,
            grid=(B, n_q),
            in_specs=[xtile1,
                      row1(D), row1(D),                              # ln1 w,b
                      _spec((D, 3 * D), lambda b, qi: (0, 0),
                            single_buffer=True),                     # wqkv
                      row1(3 * D)],                                  # bqkv
            out_specs=(xtile1, xtile1, xtile1)),
        compiler_params=pltpu.CompilerParams(
            dimension_semantics=("parallel", "parallel"),
            vmem_limit_bytes=_vmem_limit(k1_est)),
    )(xp, p["ln1_w"], p["ln1_b"], wqkv, bqkv)

    # ---- kernel 2: attention + out_proj + residual + LN2 + streamed MLP -------
    xtile2 = pl.BlockSpec((1, tq, D), lambda b, qi, ic: (b, qi, 0))
    kvspec = pl.BlockSpec((1, s_pad, D), lambda b, qi, ic: (b, 0, 0))
    row2 = lambda n: _spec((1, n), lambda b, qi, ic: (0, 0), single_buffer=True)

    k2_est = (2 * 2 * tq * D * 4                 # x tile + out tile (2x buf)
              + 2 * tq * D * 2                   # q tile
              + 2 * 2 * s_pad * D * 2            # full K, V (2x buf)
              + D * D * 2                        # wo (single-buffered)
              + 2 * (D * ti + ti * D) * 2        # w1/w2 chunks (2x buf)
              + tq * D * (2 + 4)                 # hmid + acc scratch
              + 3 * tq * s_pad * 4               # per-head score live set
              + tq * ti * 4 + 2 * tq * D * 4)    # MLP chunk + ctx/attn
    out = pl.pallas_call(
        functools.partial(_attn_mlp_kernel, eps=eps, num_heads=H, seq_real=S),
        out_shape=jax.ShapeDtypeStruct((B, s_pad, D), x.dtype),
        grid_spec=pltpu.PrefetchScalarGridSpec(
            num_scalar_prefetch=0,
            grid=(B, n_q, n_i),
            in_specs=[xtile2,                                        # residual
                      xtile2, kvspec, kvspec,                        # q, K, V
                      _spec((D, D), lambda b, qi, ic: (0, 0),
                            single_buffer=True),                     # wo
                      row2(D),                                       # bo
                      row2(D), row2(D),                              # ln2 w,b
                      pl.BlockSpec((D, ti), lambda b, qi, ic: (0, ic)),  # w1
                      pl.BlockSpec((1, ti), lambda b, qi, ic: (0, ic)),  # b1
                      pl.BlockSpec((ti, D), lambda b, qi, ic: (ic, 0)),  # w2
                      row2(D)],                                      # b2
            out_specs=xtile2,
            scratch_shapes=[pltpu.VMEM((tq, D), bf16),     # LN2 hidden
                            pltpu.VMEM((tq, D), f32)]),    # residual+MLP acc
        compiler_params=pltpu.CompilerParams(
            dimension_semantics=("parallel", "parallel", "arbitrary"),
            vmem_limit_bytes=_vmem_limit(k2_est)),
    )(xp, q, k, v, wo, p["bo"], p["ln2_w"], p["ln2_b"], w1, b1, w2, p["b2"])

    return out if s_pad == S else out[:, :S]


def siglip_encoder(x, layers, *, num_heads, eps, tq=256, mlp_chunk=512):
    # SiglipEncoder: sequential stack of encoder layers.
    for p in layers:
        x = siglip_encoder_layer(x, p, num_heads=num_heads, eps=eps,
                                 tq=tq, mlp_chunk=mlp_chunk)
    return x


# ------------------------ pure-JAX reference (check) --------------------------

def reference(x, layers, *, num_heads, eps):
    B, S, D = x.shape
    hd = D // num_heads
    scale = float(hd) ** (-0.5)

    def ln(v, w, b):
        mu = v.mean(-1, keepdims=True)
        var = ((v - mu) ** 2).mean(-1, keepdims=True)
        return (v - mu) / jnp.sqrt(var + eps) * w[0] + b[0]

    for p in layers:
        res = x
        h = ln(x, p["ln1_w"], p["ln1_b"])
        q = h @ p["wq"] + p["bq"][0]
        k = h @ p["wk"] + p["bk"][0]
        v = h @ p["wv"] + p["bv"][0]
        q = q.reshape(B, S, num_heads, hd).transpose(0, 2, 1, 3)
        k = k.reshape(B, S, num_heads, hd).transpose(0, 2, 1, 3)
        v = v.reshape(B, S, num_heads, hd).transpose(0, 2, 1, 3)
        s = jnp.einsum("bhqd,bhkd->bhqk", q, k) * scale
        pw = jax.nn.softmax(s.astype(jnp.float32), axis=-1)
        o = jnp.einsum("bhqk,bhkd->bhqd", pw, v)
        o = o.transpose(0, 2, 1, 3).reshape(B, S, D)
        o = o @ p["wo"] + p["bo"][0]
        x = res + o
        res = x
        h = ln(x, p["ln2_w"], p["ln2_b"])
        h = h @ p["w1"] + p["b1"][0]
        c = 0.7978845608028654
        h = 0.5 * h * (1.0 + jnp.tanh(c * (h + 0.044715 * h ** 3)))
        h = h @ p["w2"] + p["b2"][0]
        x = res + h
    return x


# ----------------------------------- main --------------------------------------

if __name__ == "__main__":
    # Small Siglip-like config: 2 layers, 4 heads.  S=24 with tq=16 exercises
    # the sequence padding + key masking; I=256 with mlp_chunk=128 exercises
    # the streamed MLP accumulation.
    B, S, D, I, H, L = 2, 24, 32, 256, 4, 2
    EPS = 2e-6

    key = jax.random.PRNGKey(0)
    key, xkey, *lkeys = jax.random.split(key, L + 2)

    def make_layer(k):
        ks = jax.random.split(k, 12)
        w = lambda kk, shape: jax.random.normal(kk, shape, jnp.float32) * 0.05
        return {
            "ln1_w": jnp.ones((1, D), jnp.float32),
            "ln1_b": jnp.zeros((1, D), jnp.float32),
            # Linear weights stored pre-transposed: (in_features, out_features)
            "wq": w(ks[0], (D, D)), "bq": w(ks[1], (1, D)),
            "wk": w(ks[2], (D, D)), "bk": w(ks[3], (1, D)),
            "wv": w(ks[4], (D, D)), "bv": w(ks[5], (1, D)),
            "wo": w(ks[6], (D, D)), "bo": w(ks[7], (1, D)),
            "ln2_w": jnp.ones((1, D), jnp.float32),
            "ln2_b": jnp.zeros((1, D), jnp.float32),
            "w1": w(ks[8], (D, I)), "b1": w(ks[9], (1, I)),
            "w2": w(ks[10], (I, D)), "b2": w(ks[11], (1, D)),
        }

    layers = [make_layer(k) for k in lkeys]
    x = jax.random.normal(xkey, (B, S, D), jnp.float32)

    run = jax.jit(functools.partial(siglip_encoder, num_heads=H, eps=EPS,
                                    tq=16, mlp_chunk=128))
    out = jax.block_until_ready(run(x, layers))

    ref = reference(x, layers, num_heads=H, eps=EPS)
    assert out.shape == (B, S, D)
    # Tolerance accounts for bf16 matmuls vs pure-f32 reference.
    err = float(jnp.max(jnp.abs(out - ref)))
    assert err < 2e-2, f"mismatch vs reference: max abs err {err}"

    print("KERNEL_OK")
</pallas_src>

<mosaic_0001>
module attributes {stable_mosaic.version = 11 : i64} {
  func.func @_ln_qkv_kernel(%arg0: i32, %arg1: i32, %arg2: memref<1x16x32xf32, #tpu.memory_space<vmem>>, %arg3: memref<1x32xf32, #tpu.memory_space<vmem>>, %arg4: memref<1x32xf32, #tpu.memory_space<vmem>>, %arg5: memref<32x96xbf16, #tpu.memory_space<vmem>>, %arg6: memref<1x96xf32, #tpu.memory_space<vmem>>, %arg7: memref<1x16x32xbf16, #tpu.memory_space<vmem>>, %arg8: memref<1x16x32xbf16, #tpu.memory_space<vmem>>, %arg9: memref<1x16x32xbf16, #tpu.memory_space<vmem>>) attributes {dimension_semantics = [#tpu.dimension_semantics<parallel>, #tpu.dimension_semantics<parallel>], iteration_bounds = array<i64: 2, 2>, scalar_prefetch = 0 : i64, scratch_operands = 0 : i64, tpu.core_type = #tpu.core_type<tc>, window_params = [{transform_indices = @transform_0, window_bounds = array<i64: 1, 16, 32>}, {pipeline_mode = #tpu.pipeline_mode<synchronous>, transform_indices = @transform_1, window_bounds = array<i64: 1, 32>}, {pipeline_mode = #tpu.pipeline_mode<synchronous>, transform_indices = @transform_2, window_bounds = array<i64: 1, 32>}, {pipeline_mode = #tpu.pipeline_mode<synchronous>, transform_indices = @transform_3, window_bounds = array<i64: 32, 96>}, {pipeline_mode = #tpu.pipeline_mode<synchronous>, transform_indices = @transform_4, window_bounds = array<i64: 1, 96>}, {transform_indices = @transform_5, window_bounds = array<i64: 1, 16, 32>}, {transform_indices = @transform_6, window_bounds = array<i64: 1, 16, 32>}, {transform_indices = @transform_7, window_bounds = array<i64: 1, 16, 32>}]} {
    %c0 = arith.constant 0 : index
    %c0_0 = arith.constant 0 : index
    %c0_1 = arith.constant 0 : index
    %0 = vector.load %arg2[%c0, %c0_0, %c0_1] : memref<1x16x32xf32, #tpu.memory_space<vmem>>, vector<1x16x32xf32>
    %1 = vector.shape_cast %0 : vector<1x16x32xf32> to vector<16x32xf32>
    %c0_2 = arith.constant 0 : index
    %c0_3 = arith.constant 0 : index
    %2 = vector.load %arg3[%c0_2, %c0_3] : memref<1x32xf32, #tpu.memory_space<vmem>>, vector<1x32xf32>
    %3 = vector.shape_cast %2 : vector<1x32xf32> to vector<32xf32>
    %c0_4 = arith.constant 0 : index
    %c0_5 = arith.constant 0 : index
    %4 = vector.load %arg4[%c0_4, %c0_5] : memref<1x32xf32, #tpu.memory_space<vmem>>, vector<1x32xf32>
    %5 = vector.shape_cast %4 : vector<1x32xf32> to vector<32xf32>
    %cst = arith.constant dense<0.000000e+00> : vector<16xf32>
    %6 = vector.multi_reduction <add>, %1, %cst [1] : vector<16x32xf32> to vector<16xf32>
    %7 = vector.shape_cast %6 : vector<16xf32> to vector<16x1xf32>
    %cst_6 = arith.constant 3.200000e+01 : f32
    %8 = vector.broadcast %cst_6 : f32 to vector<16x1xf32>
    %9 = arith.divf %7, %8 : vector<16x1xf32>
    %10 = vector.broadcast %9 : vector<16x1xf32> to vector<16x32xf32>
    %11 = arith.subf %1, %10 : vector<16x32xf32>
    %12 = arith.mulf %11, %11 : vector<16x32xf32>
    %cst_7 = arith.constant dense<0.000000e+00> : vector<16xf32>
    %13 = vector.multi_reduction <add>, %12, %cst_7 [1] : vector<16x32xf32> to vector<16xf32>
    %14 = vector.shape_cast %13 : vector<16xf32> to vector<16x1xf32>
    %cst_8 = arith.constant 3.200000e+01 : f32
    %15 = vector.broadcast %cst_8 : f32 to vector<16x1xf32>
    %16 = arith.divf %14, %15 : vector<16x1xf32>
    %17 = vector.broadcast %9 : vector<16x1xf32> to vector<16x32xf32>
    %18 = arith.subf %1, %17 : vector<16x32xf32>
    %cst_9 = arith.constant 2.000000e-06 : f32
    %19 = vector.broadcast %cst_9 : f32 to vector<16x1xf32>
    %20 = arith.addf %16, %19 : vector<16x1xf32>
    %21 = math.rsqrt %20 : vector<16x1xf32>
    %22 = vector.broadcast %21 : vector<16x1xf32> to vector<16x32xf32>
    %23 = arith.mulf %18, %22 : vector<16x32xf32>
    %24 = vector.shape_cast %3 : vector<32xf32> to vector<1x32xf32>
    %25 = vector.broadcast %24 : vector<1x32xf32> to vector<16x32xf32>
    %26 = arith.mulf %23, %25 : vector<16x32xf32>
    %27 = vector.shape_cast %5 : vector<32xf32> to vector<1x32xf32>
    %28 = vector.broadcast %27 : vector<1x32xf32> to vector<16x32xf32>
    %29 = arith.addf %26, %28 : vector<16x32xf32>
    %30 = arith.truncf %29 : vector<16x32xf32> to vector<16x32xbf16>
    %c0_10 = arith.constant 0 : index
    %c0_11 = arith.constant 0 : index
    %31 = vector.load %arg5[%c0_10, %c0_11] : memref<32x96xbf16, #tpu.memory_space<vmem>>, vector<32x96xbf16>
    %cst_12 = arith.constant dense<0.000000e+00> : vector<16x96xf32>
    %32 = tpu.matmul %30, %31, %cst_12 {dimension_numbers = #tpu.dot_dimension_numbers<[1], [0], [0], [1], [0, 0, 1, 1], [], []>} : vector<16x32xbf16>, vector<32x96xbf16>, vector<16x96xf32> -> vector<16x96xf32>
    %c0_13 = arith.constant 0 : index
    %c0_14 = arith.constant 0 : index
    %33 = vector.load %arg6[%c0_13, %c0_14] : memref<1x96xf32, #tpu.memory_space<vmem>>, vector<1x96xf32>
    %34 = vector.shape_cast %33 : vector<1x96xf32> to vector<96xf32>
    %35 = vector.shape_cast %34 : vector<96xf32> to vector<1x96xf32>
    %36 = vector.broadcast %35 : vector<1x96xf32> to vector<16x96xf32>
    %37 = arith.addf %32, %36 : vector<16x96xf32>
    %38 = vector.extract_strided_slice %37 {offsets = [0, 0], sizes = [16, 32], strides = [1, 1]} : vector<16x96xf32> to vector<16x32xf32>
    %39 = arith.truncf %38 : vector<16x32xf32> to vector<16x32xbf16>
    %c0_15 = arith.constant 0 : index
    %c0_16 = arith.constant 0 : index
    %c0_17 = arith.constant 0 : index
    %40 = vector.load %arg7[%c0_15, %c0_16, %c0_17] : memref<1x16x32xbf16, #tpu.memory_space<vmem>>, vector<1x16x32xbf16>
    %41 = vector.shape_cast %40 : vector<1x16x32xbf16> to vector<16x32xbf16>
    %42 = vector.shape_cast %39 : vector<16x32xbf16> to vector<1x16x32xbf16>
    tpu.vector_store %arg7[%c0_15, %c0_16, %c0_17], %42 {strides = array<i32>} : memref<1x16x32xbf16, #tpu.memory_space<vmem>>, vector<1x16x32xbf16>,
    %43 = vector.extract_strided_slice %37 {offsets = [0, 32], sizes = [16, 32], strides = [1, 1]} : vector<16x96xf32> to vector<16x32xf32>
    %44 = arith.truncf %43 : vector<16x32xf32> to vector<16x32xbf16>
    %c0_18 = arith.constant 0 : index
    %c0_19 = arith.constant 0 : index
    %c0_20 = arith.constant 0 : index
    %45 = vector.load %arg8[%c0_18, %c0_19, %c0_20] : memref<1x16x32xbf16, #tpu.memory_space<vmem>>, vector<1x16x32xbf16>
    %46 = vector.shape_cast %45 : vector<1x16x32xbf16> to vector<16x32xbf16>
    %47 = vector.shape_cast %44 : vector<16x32xbf16> to vector<1x16x32xbf16>
    tpu.vector_store %arg8[%c0_18, %c0_19, %c0_20], %47 {strides = array<i32>} : memref<1x16x32xbf16, #tpu.memory_space<vmem>>, vector<1x16x32xbf16>,
    %48 = vector.extract_strided_slice %37 {offsets = [0, 64], sizes = [16, 32], strides = [1, 1]} : vector<16x96xf32> to vector<16x32xf32>
    %49 = arith.truncf %48 : vector<16x32xf32> to vector<16x32xbf16>
    %c0_21 = arith.constant 0 : index
    %c0_22 = arith.constant 0 : index
    %c0_23 = arith.constant 0 : index
    %50 = vector.load %arg9[%c0_21, %c0_22, %c0_23] : memref<1x16x32xbf16, #tpu.memory_space<vmem>>, vector<1x16x32xbf16>
    %51 = vector.shape_cast %50 : vector<1x16x32xbf16> to vector<16x32xbf16>
    %52 = vector.shape_cast %49 : vector<16x32xbf16> to vector<1x16x32xbf16>
    tpu.vector_store %arg9[%c0_21, %c0_22, %c0_23], %52 {strides = array<i32>} : memref<1x16x32xbf16, #tpu.memory_space<vmem>>, vector<1x16x32xbf16>,
    return
  }
  func.func @transform_0(%arg0: i32, %arg1: i32) -> (i32, i32, i32) {
    %c0_i32 = arith.constant 0 : i32
    %c0_i32_0 = arith.constant 0 : i32
    return %arg0, %arg1, %c0_i32 : i32, i32, i32
  }
  func.func @transform_1(%arg0: i32, %arg1: i32) -> (i32, i32) {
    %c0_i32 = arith.constant 0 : i32
    %c0_i32_0 = arith.constant 0 : i32
    %c0_i32_1 = arith.constant 0 : i32
    return %c0_i32, %c0_i32_0 : i32, i32
  }
  func.func @transform_2(%arg0: i32, %arg1: i32) -> (i32, i32) {
    %c0_i32 = arith.constant 0 : i32
    %c0_i32_0 = arith.constant 0 : i32
    %c0_i32_1 = arith.constant 0 : i32
    return %c0_i32, %c0_i32_0 : i32, i32
  }
  func.func @transform_3(%arg0: i32, %arg1: i32) -> (i32, i32) {
    %c0_i32 = arith.constant 0 : i32
    %c0_i32_0 = arith.constant 0 : i32
    %c0_i32_1 = arith.constant 0 : i32
    return %c0_i32, %c0_i32_0 : i32, i32
  }
  func.func @transform_4(%arg0: i32, %arg1: i32) -> (i32, i32) {
    %c0_i32 = arith.constant 0 : i32
    %c0_i32_0 = arith.constant 0 : i32
    %c0_i32_1 = arith.constant 0 : i32
    return %c0_i32, %c0_i32_0 : i32, i32
  }
  func.func @transform_5(%arg0: i32, %arg1: i32) -> (i32, i32, i32) {
    %c0_i32 = arith.constant 0 : i32
    %c0_i32_0 = arith.constant 0 : i32
    return %arg0, %arg1, %c0_i32 : i32, i32, i32
  }
  func.func @transform_6(%arg0: i32, %arg1: i32) -> (i32, i32, i32) {
    %c0_i32 = arith.constant 0 : i32
    %c0_i32_0 = arith.constant 0 : i32
    return %arg0, %arg1, %c0_i32 : i32, i32, i32
  }
  func.func @transform_7(%arg0: i32, %arg1: i32) -> (i32, i32, i32) {
    %c0_i32 = arith.constant 0 : i32
    %c0_i32_0 = arith.constant 0 : i32
    return %arg0, %arg1, %c0_i32 : i32, i32, i32
  }
}

module attributes {stable_mosaic.version = 11 : i64} {
  func.func @_attn_mlp_kernel(%arg0: i32, %arg1: i32, %arg2: i32, %arg3: memref<1x16x32xf32, #tpu.memory_space<vmem>>, %arg4: memref<1x16x32xbf16, #tpu.memory_space<vmem>>, %arg5: memref<1x32x32xbf16, #tpu.memory_space<vmem>>, %arg6: memref<1x32x32xbf16, #tpu.memory_space<vmem>>, %arg7: memref<32x32xbf16, #tpu.memory_space<vmem>>, %arg8: memref<1x32xf32, #tpu.memory_space<vmem>>, %arg9: memref<1x32xf32, #tpu.memory_space<vmem>>, %arg10: memref<1x32xf32, #tpu.memory_space<vmem>>, %arg11: memref<32x128xbf16, #tpu.memory_space<vmem>>, %arg12: memref<1x128xf32, #tpu.memory_space<vmem>>, %arg13: memref<128x32xbf16, #tpu.memory_space<vmem>>, %arg14: memref<1x32xf32, #tpu.memory_space<vmem>>, %arg15: memref<1x16x32xf32, #tpu.memory_space<vmem>>, %arg16: memref<16x32xbf16, #tpu.memory_space<vmem>>, %arg17: memref<16x32xf32, #tpu.memory_space<vmem>>) attributes {dimension_semantics = [#tpu.dimension_semantics<parallel>, #tpu.dimension_semantics<parallel>, #tpu.dimension_semantics<arbitrary>], iteration_bounds = array<i64: 2, 2, 2>, scalar_prefetch = 0 : i64, scratch_operands = 2 : i64, tpu.core_type = #tpu.core_type<tc>, window_params = [{transform_indices = @transform_0, window_bounds = array<i64: 1, 16, 32>}, {transform_indices = @transform_1, window_bounds = array<i64: 1, 16, 32>}, {transform_indices = @transform_2, window_bounds = array<i64: 1, 32, 32>}, {transform_indices = @transform_3, window_bounds = array<i64: 1, 32, 32>}, {pipeline_mode = #tpu.pipeline_mode<synchronous>, transform_indices = @transform_4, window_bounds = array<i64: 32, 32>}, {pipeline_mode = #tpu.pipeline_mode<synchronous>, transform_indices = @transform_5, window_bounds = array<i64: 1, 32>}, {pipeline_mode = #tpu.pipeline_mode<synchronous>, transform_indices = @transform_6, window_bounds = array<i64: 1, 32>}, {pipeline_mode = #tpu.pipeline_mode<synchronous>, transform_indices = @transform_7, window_bounds = array<i64: 1, 32>}, {transform_indices = @transform_8, window_bounds = array<i64: 32, 128>}, {transform_indices = @transform_9, window_bounds = array<i64: 1, 128>}, {transform_indices = @transform_10, window_bounds = array<i64: 128, 32>}, {pipeline_mode = #tpu.pipeline_mode<synchronous>, transform_indices = @transform_11, window_bounds = array<i64: 1, 32>}, {transform_indices = @transform_12, window_bounds = array<i64: 1, 16, 32>}]} {
    %c0_i32 = arith.constant 0 : i32
    %0 = arith.cmpi eq, %arg2, %c0_i32 : i32
    %1 = arith.extui %0 : i1 to i32
    %c0_i32_0 = arith.constant 0 : i32
    %2 = arith.cmpi ne, %1, %c0_i32_0 : i32
    scf.if %2 {
      %c0_18 = arith.constant 0 : index
      %c0_19 = arith.constant 0 : index
      %c0_20 = arith.constant 0 : index
      %33 = vector.load %arg3[%c0_18, %c0_19, %c0_20] : memref<1x16x32xf32, #tpu.memory_space<vmem>>, vector<1x16x32xf32>
      %34 = vector.shape_cast %33 : vector<1x16x32xf32> to vector<16x32xf32>
      %c0_21 = arith.constant 0 : index
      %c0_22 = arith.constant 0 : index
      %c0_23 = arith.constant 0 : index
      %35 = vector.load %arg4[%c0_21, %c0_22, %c0_23] : memref<1x16x32xbf16, #tpu.memory_space<vmem>>, vector<1x16x32xbf16>
      %36 = vector.shape_cast %35 : vector<1x16x32xbf16> to vector<16x32xbf16>
      %c0_24 = arith.constant 0 : index
      %c0_25 = arith.constant 0 : index
      %c0_26 = arith.constant 0 : index
      %37 = vector.load %arg5[%c0_24, %c0_25, %c0_26] : memref<1x32x32xbf16, #tpu.memory_space<vmem>>, vector<1x32x32xbf16>
      %38 = vector.shape_cast %37 : vector<1x32x32xbf16> to vector<32x32xbf16>
      %c0_27 = arith.constant 0 : index
      %c0_28 = arith.constant 0 : index
      %c0_29 = arith.constant 0 : index
      %39 = vector.load %arg6[%c0_27, %c0_28, %c0_29] : memref<1x32x32xbf16, #tpu.memory_space<vmem>>, vector<1x32x32xbf16>
      %40 = vector.shape_cast %39 : vector<1x32x32xbf16> to vector<32x32xbf16>
      %41 = tpu.iota {dimensions = array<i32: 1>} : vector<16x32xi32>
      %42 = vector.extract_strided_slice %36 {offsets = [0, 0], sizes = [16, 8], strides = [1, 1]} : vector<16x32xbf16> to vector<16x8xbf16>
      %43 = vector.extract_strided_slice %38 {offsets = [0, 0], sizes = [32, 8], strides = [1, 1]} : vector<32x32xbf16> to vector<32x8xbf16>
      %cst_30 = arith.constant dense<0.000000e+00> : vector<16x32xf32>
      %44 = tpu.matmul %42, %43, %cst_30 {dimension_numbers = #tpu.dot_dimension_numbers<[1], [1], [0], [0], [0, 0, 1, 0], [], []>} : vector<16x8xbf16>, vector<32x8xbf16>, vector<16x32xf32> -> vector<16x32xf32>
      %c24_i32 = arith.constant 24 : i32
      %45 = vector.broadcast %c24_i32 : i32 to vector<16x32xi32>
      %46 = arith.cmpi slt, %41, %45 : vector<16x32xi32>
      %cst_31 = arith.constant -1.000000e+30 : f32
      %47 = vector.broadcast %cst_31 : f32 to vector<16x32xf32>
      %48 = arith.select %46, %44, %47 : vector<16x32xi1>, vector<16x32xf32>
      %cst_32 = arith.constant dense<0xFF800000> : vector<16xf32>
      %49 = vector.multi_reduction <maximumf>, %48, %cst_32 [1] : vector<16x32xf32> to vector<16xf32>
      %50 = vector.shape_cast %49 : vector<16xf32> to vector<16x1xf32>
      %51 = vector.broadcast %50 : vector<16x1xf32> to vector<16x32xf32>
      %52 = arith.subf %48, %51 : vector<16x32xf32>
      %53 = math.exp %52 : vector<16x32xf32>
      %cst_33 = arith.constant dense<0.000000e+00> : vector<16xf32>
      %54 = vector.multi_reduction <add>, %53, %cst_33 [1] : vector<16x32xf32> to vector<16xf32>
      %55 = vector.shape_cast %54 : vector<16xf32> to vector<16x1xf32>
      %56 = vector.broadcast %55 : vector<16x1xf32> to vector<16x32xf32>
      %57 = arith.divf %53, %56 : vector<16x32xf32>
      %58 = arith.truncf %57 : vector<16x32xf32> to vector<16x32xbf16>
      %59 = vector.extract_strided_slice %40 {offsets = [0, 0], sizes = [32, 8], strides = [1, 1]} : vector<32x32xbf16> to vector<32x8xbf16>
      %cst_34 = arith.constant dense<0.000000e+00> : vector<16x8xf32>
      %60 = tpu.matmul %58, %59, %cst_34 {dimension_numbers = #tpu.dot_dimension_numbers<[1], [0], [0], [1], [0, 0, 1, 1], [], []>} : vector<16x32xbf16>, vector<32x8xbf16>, vector<16x8xf32> -> vector<16x8xf32>
      %61 = vector.extract_strided_slice %36 {offsets = [0, 8], sizes = [16, 8], strides = [1, 1]} : vector<16x32xbf16> to vector<16x8xbf16>
      %62 = vector.extract_strided_slice %38 {offsets = [0, 8], sizes = [32, 8], strides = [1, 1]} : vector<32x32xbf16> to vector<32x8xbf16>
      %cst_35 = arith.constant dense<0.000000e+00> : vector<16x32xf32>
      %63 = tpu.matmul %61, %62, %cst_35 {dimension_numbers = #tpu.dot_dimension_numbers<[1], [1], [0], [0], [0, 0, 1, 0], [], []>} : vector<16x8xbf16>, vector<32x8xbf16>, vector<16x32xf32> -> vector<16x32xf32>
      %c24_i32_36 = arith.constant 24 : i32
      %64 = vector.broadcast %c24_i32_36 : i32 to vector<16x32xi32>
      %65 = arith.cmpi slt, %41, %64 : vector<16x32xi32>
      %cst_37 = arith.constant -1.000000e+30 : f32
      %66 = vector.broadcast %cst_37 : f32 to vector<16x32xf32>
      %67 = arith.select %65, %63, %66 : vector<16x32xi1>, vector<16x32xf32>
      %cst_38 = arith.constant dense<0xFF800000> : vector<16xf32>
      %68 = vector.multi_reduction <maximumf>, %67, %cst_38 [1] : vector<16x32xf32> to vector<16xf32>
      %69 = vector.shape_cast %68 : vector<16xf32> to vector<16x1xf32>
      %70 = vector.broadcast %69 : vector<16x1xf32> to vector<16x32xf32>
      %71 = arith.subf %67, %70 : vector<16x32xf32>
      %72 = math.exp %71 : vector<16x32xf32>
      %cst_39 = arith.constant dense<0.000000e+00> : vector<16xf32>
      %73 = vector.multi_reduction <add>, %72, %cst_39 [1] : vector<16x32xf32> to vector<16xf32>
      %74 = vector.shape_cast %73 : vector<16xf32> to vector<16x1xf32>
      %75 = vector.broadcast %74 : vector<16x1xf32> to vector<16x32xf32>
      %76 = arith.divf %72, %75 : vector<16x32xf32>
      %77 = arith.truncf %76 : vector<16x32xf32> to vector<16x32xbf16>
      %78 = vector.extract_strided_slice %40 {offsets = [0, 8], sizes = [32, 8], strides = [1, 1]} : vector<32x32xbf16> to vector<32x8xbf16>
      %cst_40 = arith.constant dense<0.000000e+00> : vector<16x8xf32>
      %79 = tpu.matmul %77, %78, %cst_40 {dimension_numbers = #tpu.dot_dimension_numbers<[1], [0], [0], [1], [0, 0, 1, 1], [], []>} : vector<16x32xbf16>, vector<32x8xbf16>, vector<16x8xf32> -> vector<16x8xf32>
      %80 = vector.extract_strided_slice %36 {offsets = [0, 16], sizes = [16, 8], strides = [1, 1]} : vector<16x32xbf16> to vector<16x8xbf16>
      %81 = vector.extract_strided_slice %38 {offsets = [0, 16], sizes = [32, 8], strides = [1, 1]} : vector<32x32xbf16> to vector<32x8xbf16>
      %cst_41 = arith.constant dense<0.000000e+00> : vector<16x32xf32>
      %82 = tpu.matmul %80, %81, %cst_41 {dimension_numbers = #tpu.dot_dimension_numbers<[1], [1], [0], [0], [0, 0, 1, 0], [], []>} : vector<16x8xbf16>, vector<32x8xbf16>, vector<16x32xf32> -> vector<16x32xf32>
      %c24_i32_42 = arith.constant 24 : i32
      %83 = vector.broadcast %c24_i32_42 : i32 to vector<16x32xi32>
      %84 = arith.cmpi slt, %41, %83 : vector<16x32xi32>
      %cst_43 = arith.constant -1.000000e+30 : f32
      %85 = vector.broadcast %cst_43 : f32 to vector<16x32xf32>
      %86 = arith.select %84, %82, %85 : vector<16x32xi1>, vector<16x32xf32>
      %cst_44 = arith.constant dense<0xFF800000> : vector<16xf32>
      %87 = vector.multi_reduction <maximumf>, %86, %cst_44 [1] : vector<16x32xf32> to vector<16xf32>
      %88 = vector.shape_cast %87 : vector<16xf32> to vector<16x1xf32>
      %89 = vector.broadcast %88 : vector<16x1xf32> to vector<16x32xf32>
      %90 = arith.subf %86, %89 : vector<16x32xf32>
      %91 = math.exp %90 : vector<16x32xf32>
      %cst_45 = arith.constant dense<0.000000e+00> : vector<16xf32>
      %92 = vector.multi_reduction <add>, %91, %cst_45 [1] : vector<16x32xf32> to vector<16xf32>
      %93 = vector.shape_cast %92 : vector<16xf32> to vector<16x1xf32>
      %94 = vector.broadcast %93 : vector<16x1xf32> to vector<16x32xf32>
      %95 = arith.divf %91, %94 : vector<16x32xf32>
      %96 = arith.truncf %95 : vector<16x32xf32> to vector<16x32xbf16>
      %97 = vector.extract_strided_slice %40 {offsets = [0, 16], sizes = [32, 8], strides = [1, 1]} : vector<32x32xbf16> to vector<32x8xbf16>
      %cst_46 = arith.constant dense<0.000000e+00> : vector<16x8xf32>
      %98 = tpu.matmul %96, %97, %cst_46 {dimension_numbers = #tpu.dot_dimension_numbers<[1], [0], [0], [1], [0, 0, 1, 1], [], []>} : vector<16x32xbf16>, vector<32x8xbf16>, vector<16x8xf32> -> vector<16x8xf32>
      %99 = vector.extract_strided_slice %36 {offsets = [0, 24], sizes = [16, 8], strides = [1, 1]} : vector<16x32xbf16> to vector<16x8xbf16>
      %100 = vector.extract_strided_slice %38 {offsets = [0, 24], sizes = [32, 8], strides = [1, 1]} : vector<32x32xbf16> to vector<32x8xbf16>
      %cst_47 = arith.constant dense<0.000000e+00> : vector<16x32xf32>
      %101 = tpu.matmul %99, %100, %cst_47 {dimension_numbers = #tpu.dot_dimension_numbers<[1], [1], [0], [0], [0, 0, 1, 0], [], []>} : vector<16x8xbf16>, vector<32x8xbf16>, vector<16x32xf32> -> vector<16x32xf32>
      %c24_i32_48 = arith.constant 24 : i32
      %102 = vector.broadcast %c24_i32_48 : i32 to vector<16x32xi32>
      %103 = arith.cmpi slt, %41, %102 : vector<16x32xi32>
      %cst_49 = arith.constant -1.000000e+30 : f32
      %104 = vector.broadcast %cst_49 : f32 to vector<16x32xf32>
      %105 = arith.select %103, %101, %104 : vector<16x32xi1>, vector<16x32xf32>
      %cst_50 = arith.constant dense<0xFF800000> : vector<16xf32>
      %106 = vector.multi_reduction <maximumf>, %105, %cst_50 [1] : vector<16x32xf32> to vector<16xf32>
      %107 = vector.shape_cast %106 : vector<16xf32> to vector<16x1xf32>
      %108 = vector.broadcast %107 : vector<16x1xf32> to vector<16x32xf32>
      %109 = arith.subf %105, %108 : vector<16x32xf32>
      %110 = math.exp %109 : vector<16x32xf32>
      %cst_51 = arith.constant dense<0.000000e+00> : vector<16xf32>
      %111 = vector.multi_reduction <add>, %110, %cst_51 [1] : vector<16x32xf32> to vector<16xf32>
      %112 = vector.shape_cast %111 : vector<16xf32> to vector<16x1xf32>
      %113 = vector.broadcast %112 : vector<16x1xf32> to vector<16x32xf32>
      %114 = arith.divf %110, %113 : vector<16x32xf32>
      %115 = arith.truncf %114 : vector<16x32xf32> to vector<16x32xbf16>
      %116 = vector.extract_strided_slice %40 {offsets = [0, 24], sizes = [32, 8], strides = [1, 1]} : vector<32x32xbf16> to vector<32x8xbf16>
      %cst_52 = arith.constant dense<0.000000e+00> : vector<16x8xf32>
      %117 = tpu.matmul %115, %116, %cst_52 {dimension_numbers = #tpu.dot_dimension_numbers<[1], [0], [0], [1], [0, 0, 1, 1], [], []>} : vector<16x32xbf16>, vector<32x8xbf16>, vector<16x8xf32> -> vector<16x8xf32>
      %118 = tpu.concatenate %60, %79, %98, %117 in 1 : vector<16x8xf32>, vector<16x8xf32>, vector<16x8xf32>, vector<16x8xf32> -> vector<16x32xf32>
      %119 = arith.truncf %118 : vector<16x32xf32> to vector<16x32xbf16>
      %c0_53 = arith.constant 0 : index
      %c0_54 = arith.constant 0 : index
      %120 = vector.load %arg7[%c0_53, %c0_54] : memref<32x32xbf16, #tpu.memory_space<vmem>>, vector<32x32xbf16>
      %cst_55 = arith.constant dense<0.000000e+00> : vector<16x32xf32>
      %121 = tpu.matmul %119, %120, %cst_55 {dimension_numbers = #tpu.dot_dimension_numbers<[1], [0], [0], [1], [0, 0, 1, 1], [], []>} : vector<16x32xbf16>, vector<32x32xbf16>, vector<16x32xf32> -> vector<16x32xf32>
      %c0_56 = arith.constant 0 : index
      %c0_57 = arith.constant 0 : index
      %122 = vector.load %arg8[%c0_56, %c0_57] : memref<1x32xf32, #tpu.memory_space<vmem>>, vector<1x32xf32>
      %123 = vector.shape_cast %122 : vector<1x32xf32> to vector<32xf32>
      %124 = vector.shape_cast %123 : vector<32xf32> to vector<1x32xf32>
      %125 = vector.broadcast %124 : vector<1x32xf32> to vector<16x32xf32>
      %126 = arith.addf %121, %125 : vector<16x32xf32>
      %127 = arith.addf %34, %126 : vector<16x32xf32>
      %c0_58 = arith.constant 0 : index
      %c0_59 = arith.constant 0 : index
      %128 = vector.load %arg9[%c0_58, %c0_59] : memref<1x32xf32, #tpu.memory_space<vmem>>, vector<1x32xf32>
      %129 = vector.shape_cast %128 : vector<1x32xf32> to vector<32xf32>
      %c0_60 = arith.constant 0 : index
      %c0_61 = arith.constant 0 : index
      %130 = vector.load %arg10[%c0_60, %c0_61] : memref<1x32xf32, #tpu.memory_space<vmem>>, vector<1x32xf32>
      %131 = vector.shape_cast %130 : vector<1x32xf32> to vector<32xf32>
      %cst_62 = arith.constant dense<0.000000e+00> : vector<16xf32>
      %132 = vector.multi_reduction <add>, %127, %cst_62 [1] : vector<16x32xf32> to vector<16xf32>
      %133 = vector.shape_cast %132 : vector<16xf32> to vector<16x1xf32>
      %cst_63 = arith.constant 3.200000e+01 : f32
      %134 = vector.broadcast %cst_63 : f32 to vector<16x1xf32>
      %135 = arith.divf %133, %134 : vector<16x1xf32>
      %136 = vector.broadcast %135 : vector<16x1xf32> to vector<16x32xf32>
      %137 = arith.subf %127, %136 : vector<16x32xf32>
      %138 = arith.mulf %137, %137 : vector<16x32xf32>
      %cst_64 = arith.constant dense<0.000000e+00> : vector<16xf32>
      %139 = vector.multi_reduction <add>, %138, %cst_64 [1] : vector<16x32xf32> to vector<16xf32>
      %140 = vector.shape_cast %139 : vector<16xf32> to vector<16x1xf32>
      %cst_65 = arith.constant 3.200000e+01 : f32
      %141 = vector.broadcast %cst_65 : f32 to vector<16x1xf32>
      %142 = arith.divf %140, %141 : vector<16x1xf32>
      %143 = vector.broadcast %135 : vector<16x1xf32> to vector<16x32xf32>
      %144 = arith.subf %127, %143 : vector<16x32xf32>
      %cst_66 = arith.constant 2.000000e-06 : f32
      %145 = vector.broadcast %cst_66 : f32 to vector<16x1xf32>
      %146 = arith.addf %142, %145 : vector<16x1xf32>
      %147 = math.rsqrt %146 : vector<16x1xf32>
      %148 = vector.broadcast %147 : vector<16x1xf32> to vector<16x32xf32>
      %149 = arith.mulf %144, %148 : vector<16x32xf32>
      %150 = vector.shape_cast %129 : vector<32xf32> to vector<1x32xf32>
      %151 = vector.broadcast %150 : vector<1x32xf32> to vector<16x32xf32>
      %152 = arith.mulf %149, %151 : vector<16x32xf32>
      %153 = vector.shape_cast %131 : vector<32xf32> to vector<1x32xf32>
      %154 = vector.broadcast %153 : vector<1x32xf32> to vector<16x32xf32>
      %155 = arith.addf %152, %154 : vector<16x32xf32>
      %156 = arith.truncf %155 : vector<16x32xf32> to vector<16x32xbf16>
      %c0_67 = arith.constant 0 : index
      %c0_68 = arith.constant 0 : index
      %157 = vector.load %arg16[%c0_67, %c0_68] : memref<16x32xbf16, #tpu.memory_space<vmem>>, vector<16x32xbf16>
      tpu.vector_store %arg16[%c0_67, %c0_68], %156 {strides = array<i32>} : memref<16x32xbf16, #tpu.memory_space<vmem>>, vector<16x32xbf16>,
      %c0_69 = arith.constant 0 : index
      %c0_70 = arith.constant 0 : index
      %158 = vector.load %arg14[%c0_69, %c0_70] : memref<1x32xf32, #tpu.memory_space<vmem>>, vector<1x32xf32>
      %159 = vector.shape_cast %158 : vector<1x32xf32> to vector<32xf32>
      %160 = vector.shape_cast %159 : vector<32xf32> to vector<1x32xf32>
      %161 = vector.broadcast %160 : vector<1x32xf32> to vector<16x32xf32>
      %162 = arith.addf %127, %161 : vector<16x32xf32>
      %c0_71 = arith.constant 0 : index
      %c0_72 = arith.constant 0 : index
      %163 = vector.load %arg17[%c0_71, %c0_72] : memref<16x32xf32, #tpu.memory_space<vmem>>, vector<16x32xf32>
      tpu.vector_store %arg17[%c0_71, %c0_72], %162 {strides = array<i32>} : memref<16x32xf32, #tpu.memory_space<vmem>>, vector<16x32xf32>,
    } else {
    }
    %c0 = arith.constant 0 : index
    %c0_1 = arith.constant 0 : index
    %3 = vector.load %arg16[%c0, %c0_1] : memref<16x32xbf16, #tpu.memory_space<vmem>>, vector<16x32xbf16>
    %c0_2 = arith.constant 0 : index
    %c0_3 = arith.constant 0 : index
    %4 = vector.load %arg11[%c0_2, %c0_3] : memref<32x128xbf16, #tpu.memory_space<vmem>>, vector<32x128xbf16>
    %cst = arith.constant dense<0.000000e+00> : vector<16x128xf32>
    %5 = tpu.matmul %3, %4, %cst {dimension_numbers = #tpu.dot_dimension_numbers<[1], [0], [0], [1], [0, 0, 1, 1], [], []>} : vector<16x32xbf16>, vector<32x128xbf16>, vector<16x128xf32> -> vector<16x128xf32>
    %c0_4 = arith.constant 0 : index
    %c0_5 = arith.constant 0 : index
    %6 = vector.load %arg12[%c0_4, %c0_5] : memref<1x128xf32, #tpu.memory_space<vmem>>, vector<1x128xf32>
    %7 = vector.shape_cast %6 : vector<1x128xf32> to vector<128xf32>
    %8 = vector.shape_cast %7 : vector<128xf32> to vector<1x128xf32>
    %9 = vector.broadcast %8 : vector<1x128xf32> to vector<16x128xf32>
    %10 = arith.addf %5, %9 : vector<16x128xf32>
    %cst_6 = arith.constant 5.000000e-01 : f32
    %11 = vector.broadcast %cst_6 : f32 to vector<16x128xf32>
    %12 = arith.mulf %11, %10 : vector<16x128xf32>
    %cst_7 = arith.constant 4.471500e-02 : f32
    %13 = vector.broadcast %cst_7 : f32 to vector<16x128xf32>
    %14 = arith.mulf %13, %10 : vector<16x128xf32>
    %15 = arith.mulf %14, %10 : vector<16x128xf32>
    %16 = arith.mulf %15, %10 : vector<16x128xf32>
    %17 = arith.addf %10, %16 : vector<16x128xf32>
    %cst_8 = arith.constant 0.797884583 : f32
    %18 = vector.broadcast %cst_8 : f32 to vector<16x128xf32>
    %19 = arith.mulf %18, %17 : vector<16x128xf32>
    %20 = math.tanh %19 : vector<16x128xf32>
    %cst_9 = arith.constant 1.000000e+00 : f32
    %21 = vector.broadcast %cst_9 : f32 to vector<16x128xf32>
    %22 = arith.addf %21, %20 : vector<16x128xf32>
    %23 = arith.mulf %12, %22 : vector<16x128xf32>
    %24 = arith.truncf %23 : vector<16x128xf32> to vector<16x128xbf16>
    %c0_10 = arith.constant 0 : index
    %c0_11 = arith.constant 0 : index
    %25 = vector.load %arg17[%c0_10, %c0_11] : memref<16x32xf32, #tpu.memory_space<vmem>>, vector<16x32xf32>
    %c0_12 = arith.constant 0 : index
    %c0_13 = arith.constant 0 : index
    %26 = vector.load %arg13[%c0_12, %c0_13] : memref<128x32xbf16, #tpu.memory_space<vmem>>, vector<128x32xbf16>
    %cst_14 = arith.constant dense<0.000000e+00> : vector<16x32xf32>
    %27 = tpu.matmul %24, %26, %cst_14 {dimension_numbers = #tpu.dot_dimension_numbers<[1], [0], [0], [1], [0, 0, 1, 1], [], []>} : vector<16x128xbf16>, vector<128x32xbf16>, vector<16x32xf32> -> vector<16x32xf32>
    %28 = arith.addf %25, %27 : vector<16x32xf32>
    %c0_15 = arith.constant 0 : index
    %c0_16 = arith.constant 0 : index
    %29 = vector.load %arg17[%c0_15, %c0_16] : memref<16x32xf32, #tpu.memory_space<vmem>>, vector<16x32xf32>
    tpu.vector_store %arg17[%c0_15, %c0_16], %28 {strides = array<i32>} : memref<16x32xf32, #tpu.memory_space<vmem>>, vector<16x32xf32>,
    %c1_i32 = arith.constant 1 : i32
    %30 = arith.cmpi eq, %arg2, %c1_i32 : i32
    %31 = arith.extui %30 : i1 to i32
    %c0_i32_17 = arith.constant 0 : i32
    %32 = arith.cmpi ne, %31, %c0_i32_17 : i32
    scf.if %32 {
      %c0_18 = arith.constant 0 : index
      %c0_19 = arith.constant 0 : index
      %33 = vector.load %arg17[%c0_18, %c0_19] : memref<16x32xf32, #tpu.memory_space<vmem>>, vector<16x32xf32>
      %c0_20 = arith.constant 0 : index
      %c0_21 = arith.constant 0 : index
      %c0_22 = arith.constant 0 : index
      %34 = vector.load %arg15[%c0_20, %c0_21, %c0_22] : memref<1x16x32xf32, #tpu.memory_space<vmem>>, vector<1x16x32xf32>
      %35 = vector.shape_cast %34 : vector<1x16x32xf32> to vector<16x32xf32>
      %36 = vector.shape_cast %33 : vector<16x32xf32> to vector<1x16x32xf32>
      tpu.vector_store %arg15[%c0_20, %c0_21, %c0_22], %36 {strides = array<i32>} : memref<1x16x32xf32, #tpu.memory_space<vmem>>, vector<1x16x32xf32>,
    } else {
    }
    return
  }
  func.func @transform_0(%arg0: i32, %arg1: i32, %arg2: i32) -> (i32, i32, i32) {
    %c0_i32 = arith.constant 0 : i32
    %c0_i32_0 = arith.constant 0 : i32
    return %arg0, %arg1, %c0_i32 : i32, i32, i32
  }
  func.func @transform_1(%arg0: i32, %arg1: i32, %arg2: i32) -> (i32, i32, i32) {
    %c0_i32 = arith.constant 0 : i32
    %c0_i32_0 = arith.constant 0 : i32
    return %arg0, %arg1, %c0_i32 : i32, i32, i32
  }
  func.func @transform_2(%arg0: i32, %arg1: i32, %arg2: i32) -> (i32, i32, i32) {
    %c0_i32 = arith.constant 0 : i32
    %c0_i32_0 = arith.constant 0 : i32
    %c0_i32_1 = arith.constant 0 : i32
    return %arg0, %c0_i32, %c0_i32_0 : i32, i32, i32
  }
  func.func @transform_3(%arg0: i32, %arg1: i32, %arg2: i32) -> (i32, i32, i32) {
    %c0_i32 = arith.constant 0 : i32
    %c0_i32_0 = arith.constant 0 : i32
    %c0_i32_1 = arith.constant 0 : i32
    return %arg0, %c0_i32, %c0_i32_0 : i32, i32, i32
  }
  func.func @transform_4(%arg0: i32, %arg1: i32, %arg2: i32) -> (i32, i32) {
    %c0_i32 = arith.constant 0 : i32
    %c0_i32_0 = arith.constant 0 : i32
    %c0_i32_1 = arith.constant 0 : i32
    return %c0_i32, %c0_i32_0 : i32, i32
  }
  func.func @transform_5(%arg0: i32, %arg1: i32, %arg2: i32) -> (i32, i32) {
    %c0_i32 = arith.constant 0 : i32
    %c0_i32_0 = arith.constant 0 : i32
    %c0_i32_1 = arith.constant 0 : i32
    return %c0_i32, %c0_i32_0 : i32, i32
  }
  func.func @transform_6(%arg0: i32, %arg1: i32, %arg2: i32) -> (i32, i32) {
    %c0_i32 = arith.constant 0 : i32
    %c0_i32_0 = arith.constant 0 : i32
    %c0_i32_1 = arith.constant 0 : i32
    return %c0_i32, %c0_i32_0 : i32, i32
  }
  func.func @transform_7(%arg0: i32, %arg1: i32, %arg2: i32) -> (i32, i32) {
    %c0_i32 = arith.constant 0 : i32
    %c0_i32_0 = arith.constant 0 : i32
    %c0_i32_1 = arith.constant 0 : i32
    return %c0_i32, %c0_i32_0 : i32, i32
  }
  func.func @transform_8(%arg0: i32, %arg1: i32, %arg2: i32) -> (i32, i32) {
    %c0_i32 = arith.constant 0 : i32
    %c0_i32_0 = arith.constant 0 : i32
    return %c0_i32, %arg2 : i32, i32
  }
  func.func @transform_9(%arg0: i32, %arg1: i32, %arg2: i32) -> (i32, i32) {
    %c0_i32 = arith.constant 0 : i32
    %c0_i32_0 = arith.constant 0 : i32
    return %c0_i32, %arg2 : i32, i32
  }
  func.func @transform_10(%arg0: i32, %arg1: i32, %arg2: i32) -> (i32, i32) {
    %c0_i32 = arith.constant 0 : i32
    %c0_i32_0 = arith.constant 0 : i32
    return %arg2, %c0_i32 : i32, i32
  }
  func.func @transform_11(%arg0: i32, %arg1: i32, %arg2: i32) -> (i32, i32) {
    %c0_i32 = arith.constant 0 : i32
    %c0_i32_0 = arith.constant 0 : i32
    %c0_i32_1 = arith.constant 0 : i32
    return %c0_i32, %c0_i32_0 : i32, i32
  }
  func.func @transform_12(%arg0: i32, %arg1: i32, %arg2: i32) -> (i32, i32, i32) {
    %c0_i32 = arith.constant 0 : i32
    %c0_i32_0 = arith.constant 0 : i32
    return %arg0, %arg1, %c0_i32 : i32, i32, i32
  }
}

</mosaic_0001>

<bundles_post_ra>
// kernel: siglip_encoder.4
= control target key start
LH: loop header
LB: loop body
LE: loop exit
PB: predicated region body
PF: predicated region fallthrough
CT: control target
= control target key end

     0   :  { %s873_s24 = smov 0   ;;  %s875_s25 = smov 0   ;;  %s960_s0 = inlined_call_operand.vmem [shape: f32[2,32,32], index: 0, kind: input, shape index: {}]   ;;  %s961_s1 = inlined_call_operand.vmem [shape: f32[1,32], index: 1, kind: input, shape index: {}]   ;;  %s962_s2 = inlined_call_operand.vmem [shape: f32[1,32], index: 2, kind: input, shape index: {}]   ;;  %s963_s3 = inlined_call_operand.vmem [shape: bf16[32,96], index: 3, kind: input, shape index: {}]   ;;  %s964_s4 = inlined_call_operand.vmem [shape: f32[1,96], index: 4, kind: input, shape index: {}]   ;;  %s965_s5 = inlined_call_operand.vmem [shape: bf16[2,32,32], index: 5, kind: output, shape index: {0}]   ;;  %s966_s6 = inlined_call_operand.vmem [shape: bf16[2,32,32], index: 6, kind: output, shape index: {1}]   ;;  %s967_s7 = inlined_call_operand.vmem [shape: bf16[2,32,32], index: 7, kind: output, shape index: {2}]  }
   0x1   :  { %s877_s26 = smov 0   ;;  %s879_s27 = smov 0  }
   0x2   :  { %s881_s28 = smov 0  }
   0x3 LB: > { %s27_s29 = sadd.s32 1, %s819_s26  ;;  %s30_s30 = sadd.s32 1, %s823_s27  ;;  %s827_s28 = sphi %s881_s28, %s18_s28   ;;  %s823_s27 = sphi %s879_s27, %s971_s27   ;;  %s819_s26 = sphi %s877_s26, %s970_s26   ;;  %s815_s25 = sphi %s875_s25, %s969_s25   ;;  %s811_s24 = sphi %s873_s24, %s968_s24  }
   0x4   : > { %p28_p0 = scmp.ge.s32.totalorder %s27_s29, 2  ;;  %p703_p1 = scmp.ge.s32.totalorder %s827_s28, 1 }
   0x5   : > { %p267_p2 = scmp.lt.s32.totalorder %s827_s28, 5 }
   0x6   : > { %s973_s29 = smov (%p28_p0, %s27_s29), 0  ;;  %s975_s30 = smov (!%p28_p0, %s30_s30), %s823_s27 }
   0x7   : > { %p268_p3 = pnand %p703_p1, %p267_p2  ;;  %p32_p4 = scmp.ge.s32.totalorder %s975_s30, 2 }
   0x8   : > { %s704_s8 = sshll.u32 (!%p268_p3), %s811_s24, 1  ;;  %p326_p5 = scmp.lt.s32.totalorder (!%p268_p3), %s815_s25, 1 }
   0x9   : > { %s977_s30 = smov (%p32_p4, %s975_s30), 0  ;;  %271 = sbr.rel (%p268_p3) target bundleno = 655 (0x28f), region = 40 }
   0xa   : > { %p328_p6 = scmp.lt.s32.totalorder (!%p268_p3), %s704_s8, 3  ;;  %s831_s12 = smov (!%p268_p3), 64  }
   0xe   : > { %s979_s25 = smov (!%p326_p5, %s815_s25), 1  ;;  %s981_s8 = smov (!%p328_p6, %s704_s8), 3  ;;  %vm370_vm0 = vcmask 261120   ;;  %v783_v14 = vld [vmem:[%s963_s3 + $0x8] sm:$0xff]   ;;  %v829_v15 = vmov 0.0   ;;  %vm830_vm1 = vmmov 0  }
   0xf   : > { %s705_s9 = sshll.u32 %s979_s25, 2  ;;  %731 = vmatprep.subr.bf16.mxu0 %v829_v15  ;;  %735 = vmatprep.mubr.msk.bf16.mxu0 %vm830_vm1, %v829_v15  ;;  %v784_v16 = vld [vmem:[%s963_s3] sm:$0xff]   ;;  %vm490_vm2 = vcmask 257024  }
  0x10   : > { %s903_s10 = sadd.s32 %s705_s9, %s981_s8  ;;  %732 = vmatpush3.bf16.msra.mxu0 %v783_v14  ;;  %v716_v25 = vld [vmem:[%s961_s1] ss:$0 sm:$0xff] }
  0x11   : > { %s706_s11 = sshll.u32 %s903_s10, 3  ;;  %733 = vmatprep.subr.bf16.mxu0 %v829_v15  ;;  %v717_v29 = vld [vmem:[%s962_s2] ss:$0 sm:$0xff]  ;;  %s709_s23 = sshll.u32 %s903_s10, 2 }
  0x12   : > { %s333_s14 = scalar_lea.vmem %s960_s0, %s706_s11  ;;  %v718_v34 = vld [vmem:[%s964_s4] ss:$0 sm:$0xff]  ;;  %s343_s11 = scalar_lea.vmem %s965_s5, %s709_s23 }
  0x13   : > { %v366_v0 = vld [vmem:[%s333_s14] sm:$0xff]  ;;  %v367_v1 = vld [vmem:[%s333_s14 + $0x8] sm:$0xff]  ;;  %s832_s10 = smov 96   ;;  %s363_s15 = scalar_lea.vmem %s967_s7, %s709_s23 }
  0x14   : > { %v371_v2 = vsel %vm370_vm0, %v366_v0, 0.0  ;;  %v374_v3 = vsel %vm370_vm0, %v367_v1, 0.0  ;;  %734 = vmatpush3.bf16.msra.mxu0 %v784_v16  ;;  %s353_s18 = scalar_lea.vmem %s966_s6, %s709_s23 }
  0x15   : > { %372 = vadd.xlane.f32.xlu0 %v371_v2 }
  0x19   : > { %375 = vadd.xlane.f32.xlu0 %v374_v3 }
  0x9e   : > { %v373_v4 = vpop.xlane.xlu0 %372 }
  0x9f   : > { %v378_v5 = vmul.f32 0.03125, %v373_v4 }
  0xa1   : > { %v380_v6 = vsub.f32 %v366_v0, %v378_v5 }
  0xa2   : > { %v376_v7 = vpop.xlane.xlu0 %375 }
  0xa3   : > { %v379_v8 = vmul.f32 0.03125, %v376_v7  ;;  %v382_v9 = vmul.f32 %v380_v6, %v380_v6 }
  0xa5   : > { %v381_v10 = vsub.f32 %v367_v1, %v379_v8  ;;  %v384_v11 = vsel %vm370_vm0, %v382_v9, 0.0 }
  0xa6   : > { %385 = vadd.xlane.f32.xlu1 %v384_v11 }
  0xa7   : > { %v383_v12 = vmul.f32 %v381_v10, %v381_v10 }
  0xa9   : > { %v387_v13 = vsel %vm370_vm0, %v383_v12, 0.0 }
  0xaa   : > { %388 = vadd.xlane.f32.xlu1 %v387_v13 }
 0x12f   : > { %v386_v17 = vpop.xlane.xlu1 %385 }
 0x130   : > { %v390_v18 = vmul.f32 0.03125, %v386_v17 }
 0x132   : > { %v392_v19 = vadd.f32 2e-06, %v390_v18 }
 0x133   : > { %v389_v20 = vpop.xlane.xlu1 %388 }
 0x134   : > { %785 = vrsqrt.f32 %v392_v19  ;;  %v391_v21 = vmul.f32 0.03125, %v389_v20 }
 0x136   : > { %v393_v22 = vadd.f32 2e-06, %v391_v21 }
 0x138   : > { %787 = vrsqrt.f32 %v393_v22 }
 0x141   : > { %v786_v23 = vpop.eup %785 }
 0x142   : > { %v396_v24 = vmul.f32 %v786_v23, %v380_v6 }
 0x144   : > { %v404_v28 = vmul.f32 %v716_v25, %v396_v24 }
 0x145   : > { %v788_v26 = vpop.eup %787 }
 0x146   : > { %v397_v27 = vmul.f32 %v788_v26, %v381_v10  ;;  %v412_v31 = vadd.f32 %v717_v29, %v404_v28 }
 0x148   : > { %v405_v30 = vmul.f32 %v716_v25, %v397_v27 }
 0x14a   : > { %v413_v32 = vadd.f32 %v717_v29, %v405_v30 }
 0x14c   : > { %v414_v33 = vpack.c.bf16 %v413_v32, %v412_v31 }
 0x14e   : > { %736 = vmatmul.mubr.msk.bf16.vlgmr.msra.gmra.mxu0 %vm370_vm0, %v414_v33 }
 0x20e   : > { %v475_v35 = vpop.f32.mrf.mxu0 }
 0x20f   : > { %v476_v36 = vadd.f32 %v718_v34, %v475_v35 }
 0x210   : > { %v737_v37 = vpop.f32.mrf.mxu0 }
 0x211   : > { %v726_v38 = vpack.c.bf16 %v476_v36, %v476_v36 }
 0x212   : > { %v478_v39 = vpop.f32.mrf.mxu0 }
 0x213   : > { %491 = vst.msk [vmem:[%s343_s11] sm:$0xf] %vm490_vm2, %v726_v38  ;;  %v479_v40 = vadd.f32 %v718_v34, %v478_v39  ;;  %501 = vrot.lane.b32.xlu1 %v726_v38, %s831_s12  ;;  %493 = vrot.lane.b32.xlu0 %v726_v38, %s832_s10 }
 0x214   : > { %v738_v41 = vpop.f32.mrf.mxu0 }
 0x215   : > { %v727_v42 = vpack.c.bf16 %v479_v40, %v479_v40 }
 0x217   : > { %492 = vst.msk [vmem:[%s343_s11 + $0x4] sm:$0xf] %vm490_vm2, %v727_v42  ;;  %495 = vrot.lane.b32.xlu1 %v727_v42, %s832_s10 }
 0x21b   : > { %503 = vrot.lane.b32.xlu1 %v727_v42, %s831_s12 }
 0x285   : > { %v502_v43 = vpop.permute.xlu1 %501  ;;  %v494_v44 = vpop.permute.xlu0 %493 }
 0x286   : > { %507 = vst.msk [vmem:[%s363_s15] sm:$0xf] %vm490_vm2, %v502_v43  ;;  %499 = vst.msk [vmem:[%s353_s18] sm:$0xf] %vm490_vm2, %v494_v44 }
 0x289   : > { %v496_v45 = vpop.permute.xlu1 %495 }
 0x28a   : > { %500 = vst.msk [vmem:[%s353_s18 + $0x4] sm:$0xf] %vm490_vm2, %v496_v45 }
 0x28d   : > { %v504_v46 = vpop.permute.xlu1 %503 }
 0x28e   : > { %508 = vst.msk [vmem:[%s363_s15 + $0x4] sm:$0xf] %vm490_vm2, %v504_v46 }
 0x28f PF: > { %s18_s28 = sadd.s32 1, %s827_s28   ;;  %s968_s24 = smov %s819_s26 }
 0x290   : > { %p15_p7 = scmp.ge.s32.totalorder %s18_s28, 6   ;;  %s969_s25 = smov %s823_s27 }
 0x291   : > { %s970_s26 = smov %s973_s29  ;;  %s971_s27 = smov %s977_s30 }
 0x292   :  { %17 = sbr.rel (!%p15_p7) target bundleno = 3 (0x3), region = 94 }

// kernel: siglip_encoder.5
= control target key start
LH: loop header
LB: loop body
LE: loop exit
PB: predicated region body
PF: predicated region fallthrough
CT: control target
= control target key end

     0   :  { %s2620_s0 = inlined_call_operand.vmem [shape: f32[2,32,32], index: 0, kind: input, shape index: {}]   ;;  %s2621_s1 = inlined_call_operand.vmem [shape: bf16[2,32,32], index: 1, kind: input, shape index: {}]   ;;  %s2622_s2 = inlined_call_operand.vmem [shape: bf16[2,32,32], index: 2, kind: input, shape index: {}]   ;;  %s2623_s3 = inlined_call_operand.vmem [shape: bf16[2,32,32], index: 3, kind: input, shape index: {}]   ;;  %s2624_s4 = inlined_call_operand.vmem [shape: bf16[32,32], index: 4, kind: input, shape index: {}]   ;;  %s2625_s5 = inlined_call_operand.vmem [shape: f32[1,32], index: 5, kind: input, shape index: {}]   ;;  %s2626_s6 = inlined_call_operand.vmem [shape: f32[1,32], index: 6, kind: input, shape index: {}]   ;;  %s2627_s7 = inlined_call_operand.vmem [shape: f32[1,32], index: 7, kind: input, shape index: {}]   ;;  %s2628_s8 = inlined_call_operand.vmem [shape: bf16[32,256], index: 8, kind: input, shape index: {}]   ;;  %s2629_s9 = inlined_call_operand.vmem [shape: f32[1,256], index: 9, kind: input, shape index: {}]   ;;  %s2630_s10 = inlined_call_operand.vmem [shape: bf16[256,32], index: 10, kind: input, shape index: {}]   ;;  %s2631_s11 = inlined_call_operand.vmem [shape: f32[1,32], index: 11, kind: input, shape index: {}]   ;;  %s2632_s12 = inlined_call_operand.vmem [shape: f32[2,32,32], index: 12, kind: output, shape index: {}]  }
   0x1   :  { %2639 = sst [smem:[#allocation14_spill]] %s2627_s7 }
   0x2   :  { %2640 = sst [smem:[#allocation15_spill]] %s2628_s8 }
   0x3   :  { %s2274_s21 = smov 0   ;;  %s2276_s22 = smov 0  }
   0x4   :  { %s2278_s23 = smov 0   ;;  %s2280_s24 = smov 0  }
   0x5   :  { %s2282_s25 = smov 0   ;;  %s2284_s26 = smov 0  }
   0x6   :  { %s2286_s27 = smov 0   ;;  %s2288_s28 = smov 0  }
   0x7   :  { %s2290_s29 = smov 0  }
   0x8 LB: > { %2641 = sst [smem:[#allocation5_spill]] %s2169_s22  ;;  %s34_s30 = sadd.s32 1, %s2185_s26  ;;  %s2197_s29 = sphi %s2290_s29, %s22_s29   ;;  %s2193_s28 = sphi %s2288_s28, %s2660_s28   ;;  %s2189_s27 = sphi %s2286_s27, %s2659_s27   ;;  %s2185_s26 = sphi %s2284_s26, %s2658_s26   ;;  %s2181_s25 = sphi %s2282_s25, %s2657_s25   ;;  %s2177_s24 = sphi %s2280_s24, %s2656_s24   ;;  %s2173_s23 = sphi %s2278_s23, %s2655_s23   ;;  %s2169_s22 = sphi %s2276_s22, %s2654_s22   ;;  %s2165_s21 = sphi %s2274_s21, %s2653_s21  }
   0x9   : > { %2642 = sst [smem:[#allocation6_spill]] %s2185_s26  ;;  %p35_p0 = scmp.ge.s32.totalorder %s34_s30, 2 }
   0xa   : > { %2643 = sst [smem:[#allocation7_spill]] %s2189_s27  ;;  %s37_s13 = sadd.s32 1, %s2189_s27 }
   0xb   : > { %2644 = sst [smem:[#allocation8_spill]] %s2193_s28  ;;  %s41_s14 = sadd.s32 1, %s2193_s28 }
   0xc   : > { %2645 = sst [smem:[#allocation9_spill]] %s2197_s29  ;;  %p247_p1 = scmp.ne.s32.totalorder %s2169_s22, %s2165_s21 }
   0xd   : > { %s2662_s30 = smov (%p35_p0, %s34_s30), 0  ;;  %s2664_s13 = smov (!%p35_p0, %s37_s13), %s2189_s27 }
   0xe   : > { %2646 = sst [smem:[#allocation10_spill]] %s2662_s30  ;;  %s237_s15 = ssub.s32 %s2185_s26, %s2662_s30 }
   0xf   : > { %p248_p2 = scmp.eq.s32.totalorder %s2197_s29, 0  ;;  %p39_p3 = scmp.ge.s32.totalorder %s2664_s13, 2 }
  0x10   : > { %p238_p4 = scmp.eq.s32.totalorder %s237_s15, 0  ;;  %s240_s16 = sadd.s32 1, %s2169_s22 }
  0x11   : > { %p249_p5 = por %p248_p2, %p247_p1  ;;  %s2666_s13 = smov (%p39_p3, %s2664_s13), 0 }
  0x12   : > { %2647 = sst [smem:[#allocation11_spill]] %s2666_s13  ;;  %s2668_s14 = smov (!%p39_p3, %s41_s14), %s2193_s28 }
  0x13   : > { %s2335_s17 = scalar_select %p238_p4, %s2169_s22, %s240_s16  }
  0x14   : > { %p43_p6 = scmp.ge.s32.totalorder %s2668_s14, 2  ;;  %p1770_p7 = scmp.ge.s32.totalorder %s2197_s29, 8 }
  0x15   : > { %2648 = sst [smem:[#allocation12_spill]] %s2335_s17 }
  0x16   : > { %s2670_s14 = smov (%p43_p6, %s2668_s14), 0  ;;  %389 = sbr.rel (%p1770_p7) target bundleno = 39 (0x27), region = 36 }
  0x17   : > { %2649 = sst [smem:[#allocation13_spill]] %s2670_s14 }
  0x1b   : > { %434 = sbr.rel (!%p249_p5) target bundleno = 39 (0x27), region = 56  ;;  %s436_s18 = sand.u32 (%p249_p5), 1, %s2169_s22  }
  0x1c   : > { %s1772_s19 = sshll.u32 (%p249_p5), %s2185_s26, 2  ;;  %s1771_s20 = sshll.u32 (%p249_p5), %s436_s18, 4 }
  0x1d   : > { %s2650_s8 = sld [smem:[#allocation15_spill]] (%p249_p5)  ;;  %s438_s16 = scalar_lea.vmem (%p249_p5), [#allocation4], %s1771_s20 }
  0x23   : > { %s440_s27 = scalar_lea.vmem %s2650_s8, %s1772_s19 }
  0x24   : > { %v457_v0 = vld [vmem:[%s440_s27] sm:$0xf]  ;;  %v459_v1 = vld [vmem:[%s440_s27 + $0x8] sm:$0xf]  ;;  %v461_v2 = vld [vmem:[%s440_s27 + $0x10] sm:$0xf] }
  0x25   : > { %458 = vst [vmem:[%s438_s16] sm:$0xf] %v457_v0  ;;  %460 = vst [vmem:[%s438_s16 + $0x4] sm:$0xf] %v459_v1  ;;  %v463_v3 = vld [vmem:[%s440_s27 + $0x18] sm:$0xf] }
  0x26   : > { %462 = vst [vmem:[%s438_s16 + $0x8] sm:$0xf] %v461_v2  ;;  %464 = vst [vmem:[%s438_s16 + $0xc] sm:$0xf] %v463_v3 }
  0x27 PF: > { %p1773_p8 = scmp.ge.s32.totalorder %s2197_s29, 1  ;;  %p510_p9 = scmp.lt.s32.totalorder %s2197_s29, 9 }
  0x29   : > { %p511_p10 = pnand %p1773_p8, %p510_p9 }
  0x2a   : > { %s517_s30 = sand.u32 (!%p511_p10), 1, %s2165_s21   ;;  %s1775_s18 = sshll.u32 (!%p511_p10), %s2177_s24, 1 }
  0x2b   : > { %514 = sbr.rel (%p511_p10) target bundleno = 3452 (0xd7c), region = 105  ;;  %s2349_s19 = sshll.u32 (!%p511_p10), %s517_s30, 4 }
  0x2c   : > { %p599_p11 = scmp.lt.s32.totalorder (!%p511_p10), %s2181_s25, 1  ;;  %p601_p12 = scmp.lt.s32.totalorder (!%p511_p10), %s1775_s18, 3 }
  0x2d   : > { %p628_p13 = scmp.lt.s32.totalorder (!%p511_p10), %s2173_s23, 1  ;;  %s1785_s8 = sshll.u32 (!%p511_p10), %s2173_s23, 4 }
  0x2e   : > { %p632_p0 = scmp.lt.s32.totalorder (!%p511_p10), %s1785_s8, 31  ;;  %p1790_p1 = scmp.ne.s32.totalorder (!%p511_p10), %s2173_s23, 0 }
  0x30   : > { %s2672_s25 = smov (!%p599_p11, %s2181_s25), 1  ;;  %s2674_s18 = smov (!%p601_p12, %s1775_s18), 3 }
  0x31   : > { %s1776_s27 = sshll.u32 %s2672_s25, 2  ;;  %s1829_s20 = sshll.u32 %s2672_s25, 4 }
  0x32   : > { %s604_s15 = sadd.s32 %s1776_s27, %s2674_s18  ;;  %s622_s14 = scalar_lea.vmem %s2622_s2, %s1829_s20 }
  0x33   : > { %s1777_s13 = sshll.u32 %s604_s15, 3  ;;  %s1780_s21 = sshll.u32 %s604_s15, 2 }
  0x34   : > { %s2359_s30 = scalar_lea.vmem %s2620_s0, %s1777_s13  ;;  %s616_s22 = scalar_lea.vmem %s2621_s1, %s1780_s21 }
  0x35   : > { %s2367_s25 = scalar_lea.vmem %s2623_s3, %s1829_s20  ;;  %s2374_s15 = scalar_lea.vmem %s2632_s12, %s1777_s13 }
  0x36   : > { %s2377_s16 = scalar_select %p628_p13, %s2173_s23, 1 }
  0x37   : > { %s2676_s8 = smov (!%p632_p0, %s1785_s8), 31  ;;  %s519_s21 = scalar_lea.vmem [#allocation4], %s2349_s19 }
  0x38   : > { %s630_s26 = scalar_lea.vmem %s2629_s9, %s2377_s16  ;;  %s1786_s17 = sshll.u32 %s2676_s8, 2 }
  0x39   : > { %s2386_s20 = scalar_lea.vmem %s2630_s10, %s1786_s17  ;;  %651 = sbr.rel (%p1790_p1) target bundleno = 3006 (0xbbe), region = 113 }
  0x3a   : > { %s2202_s13 = smov (!%p1790_p1), 112   ;;  %s2205_s8 = smov (!%p1790_p1), 16  }
  0x3b   : > { %s2206_s17 = smov (!%p1790_p1), 24   ;;  %s2651_s18 = sld [smem:[#allocation14_spill]] (!%p1790_p1) }
  0x3e   : > { %v2390_v4 = vld [vmem:[%s622_s14 + $0x8] sm:$0xff]   ;;  %v2199_v5 = vmov 0.0   ;;  %vm681_vm0 = vcmask 64512   ;;  %v2396_v7 = vld [vmem:[%s622_s14] sm:$0xff]   ;;  %vm2200_vm1 = vmmov 0   ;;  %v664_v10 = vlaneseq  ;;  %s2203_s14 = smov 104  }
  0x3f   : > { %1872 = vmatprep.subr.bf16.mxu0 %v2199_v5  ;;  %1880 = vmatprep.subr.bf16.mxu1 %v2199_v5  ;;  %v689_v6 = vsel %vm681_vm0, %v2390_v4, 0  ;;  %v686_v8 = vsel %vm681_vm0, %v2396_v7, 0  ;;  %v2406_v9 = vld [vmem:[%s616_s22] sm:$0xff]   ;;  %vm735_vm3 = vcmask 261120   ;;  %s2201_s22 = smov 120   ;;  %v2426_v30 = vld [vmem:[%s2367_s25 + $0x8] sm:$0xff]  }
  0x40   : > { %1873 = vmatpush3.bf16.xpose.msra.mxu0 %v689_v6  ;;  %1876 = vmatprep.mubr.msk.bf16.mxu0 %vm2200_vm1, %v2199_v5  ;;  %v2412_v11 = vand.u32 127, %v664_v10  ;;  %v2430_v31 = vld [vmem:[%s2367_s25] sm:$0xff]   ;;  %s2204_s25 = smov 8   ;;  %vm1234_vm4 = vcmask 130048   ;;  %vm1237_vm5 = vcmask 195584   ;;  %vm1363_vm6 = vcmask 257024  }
  0x41   : > { %1874 = vmatprep.subr.bf16.mxu0 %v2199_v5  ;;  %1884 = vmatprep.mubr.msk.bf16.mxu1 %vm2200_vm1, %v2199_v5 }
  0x42   : > { %vm732_vm2 = vcmp.lt.s32.totalorder %v2412_v11, 24  ;;  %1881 = vmatpush3.bf16.msra.mxu1 %v2426_v30 }
  0x43   : > { %1882 = vmatprep.subr.bf16.mxu1 %v2199_v5 }
  0x46   : > { %1883 = vmatpush3.bf16.msra.mxu1 %v2430_v31 }
  0x47   : > { %1888 = vmatprep.subr.bf16.mxu1 %v2199_v5 }
  0x48   : > { %1875 = vmatpush3.bf16.xpose.msra.mxu0 %v686_v8 }
  0x49   : > { %1896 = vmatprep.subr.bf16.mxu0 %v2199_v5 }
  0x4f   : > { %1877 = vmatmul.mubr.msk.bf16.vlgmr.msra.gmra.mxu0 %vm681_vm0, %v2406_v9 }
  0x50   : > { %1900 = vmatprep.mubr.msk.bf16.mxu0 %vm2200_vm1, %v2199_v5 }
 0x10f   : > { %v725_v12 = vpop.f32.mrf.mxu0 }
 0x110   : > { %v733_v13 = vsel %vm732_vm2, %v725_v12, -1e+30 }
 0x111   : > { %v1878_v14 = vpop.f32.mrf.mxu0  ;;  %v736_v15 = vsel %vm735_vm3, %v733_v13, -inf }
 0x112   : > { %737 = vmax.xlane.f32.xlu0 %v736_v15 }
 0x113   : > { %v728_v16 = vpop.f32.mrf.mxu0 }
 0x114   : > { %v734_v17 = vsel %vm732_vm2, %v728_v16, -1e+30 }
 0x115   : > { %v1879_v18 = vpop.f32.mrf.mxu0  ;;  %v739_v19 = vsel %vm735_vm3, %v734_v17, -inf }
 0x116   : > { %740 = vmax.xlane.f32.xlu0 %v739_v19 }
 0x12c   : > { %819 = vrot.lane.b32.xlu0 %v2390_v4, %s2201_s22 }
 0x19b   : > { %v738_v20 = vpop.xlane.xlu0 %737 }
 0x19c   : > { %v742_v21 = vsub.f32 %v733_v13, %v738_v20 }
 0x19e   : > { %v744_v22 = vmul.f32 1.442695, %v742_v21 }
 0x19f   : > { %v741_v23 = vpop.xlane.xlu0 %740 }
 0x1a0   : > { %2076 = vpow2.f32 %v744_v22  ;;  %v743_v24 = vsub.f32 %v734_v17, %v741_v23 }
 0x1a2   : > { %v746_v25 = vmul.f32 1.442695, %v743_v24 }
 0x1a3   : > { %v820_v36 = vpop.permute.xlu0 %819 }
 0x1a4   : > { %2078 = vpow2.f32 %v746_v25  ;;  %v828_v39 = vsel %vm681_vm0, %v820_v36, 0 }
 0x1ad   : > { %v2077_v26 = vpop.eup %2076 }
 0x1ae   : > { %v748_v27 = vsel %vm735_vm3, %v2077_v26, 0.0 }
 0x1af   : > { %749 = vadd.xlane.f32.xlu1 %v748_v27 }
 0x1b1   : > { %v2079_v28 = vpop.eup %2078 }
 0x1b2   : > { %v751_v29 = vsel %vm735_vm3, %v2079_v28, 0.0 }
 0x1b3   : > { %752 = vadd.xlane.f32.xlu1 %v751_v29 }
 0x1c4   : > { %817 = vrot.lane.b32.xlu1 %v2396_v7, %s2201_s22 }
 0x1c8   : > { %815 = vrot.lane.b32.xlu1 %v2406_v9, %s2201_s22 }
 0x238   : > { %v750_v32 = vpop.xlane.xlu1 %749 }
 0x239   : > { %2080 = vrcp.f32 %v750_v32 }
 0x23c   : > { %v753_v33 = vpop.xlane.xlu1 %752 }
 0x23d   : > { %2082 = vrcp.f32 %v753_v33 }
 0x240   : > { %v818_v41 = vpop.permute.xlu1 %817 }
 0x241   : > { %v825_v42 = vsel %vm681_vm0, %v818_v41, 0 }
 0x244   : > { %v816_v43 = vpop.permute.xlu1 %815 }
 0x246   : > { %v2081_v34 = vpop.eup %2080 }
 0x247   : > { %v755_v37 = vmul.f32 %v2081_v34, %v2077_v26 }
 0x24a   : > { %v2083_v35 = vpop.eup %2082 }
 0x24b   : > { %v757_v38 = vmul.f32 %v2083_v35, %v2079_v28 }
 0x24d   : > { %v758_v40 = vpack.c.bf16 %v757_v38, %v755_v37 }
 0x24f   : > { %1885 = vmatmul.mubr.msk.bf16.vlgmr.msra.gmra.mxu1 %vm735_vm3, %v758_v40 }
 0x250   : > { %1889 = vmatpush3.bf16.xpose.msra.mxu1 %v828_v39  ;;  %1892 = vmatprep.mubr.msk.bf16.mxu1 %vm2200_vm1, %v2199_v5 }
 0x251   : > { %1890 = vmatprep.subr.bf16.mxu1 %v2199_v5 }
 0x258   : > { %1891 = vmatpush3.bf16.xpose.msra.mxu1 %v825_v42 }
 0x259   : > { %1912 = vmatprep.subr.bf16.mxu1 %v2199_v5 }
 0x25f   : > { %1893 = vmatmul.mubr.msk.bf16.vlgmr.msra.gmra.mxu1 %vm681_vm0, %v816_v43 }
 0x260   : > { %1916 = vmatprep.mubr.msk.bf16.mxu1 %vm2200_vm1, %v2199_v5 }
 0x30f   : > { %v2449_v44 = vpop.f32.mrf.mxu1 }
 0x311   : > { %v1886_v45 = vpop.f32.mrf.mxu1 }
 0x313   : > { %v2451_v46 = vpop.f32.mrf.mxu1 }
 0x315   : > { %v1887_v47 = vpop.f32.mrf.mxu1 }
 0x31f   : > { %v864_v48 = vpop.f32.mrf.mxu1 }
 0x320   : > { %v871_v49 = vsel %vm732_vm2, %v864_v48, -1e+30 }
 0x321   : > { %v1894_v50 = vpop.f32.mrf.mxu1  ;;  %v873_v51 = vsel %vm735_vm3, %v871_v49, -inf }
 0x322   : > { %874 = vmax.xlane.f32.xlu1 %v873_v51 }
 0x323   : > { %v867_v52 = vpop.f32.mrf.mxu1 }
 0x324   : > { %v872_v53 = vsel %vm732_vm2, %v867_v52, -1e+30 }
 0x325   : > { %v1895_v54 = vpop.f32.mrf.mxu1  ;;  %v876_v55 = vsel %vm735_vm3, %v872_v53, -inf }
 0x326   : > { %877 = vmax.xlane.f32.xlu0 %v876_v55 }
 0x333   : > { %898 = vrot.lane.b32.xlu1 %v2426_v30, %s2201_s22 }
 0x337   : > { %950 = vrot.lane.b32.xlu1 %v2390_v4, %s2202_s13 }
 0x33b   : > { %948 = vrot.lane.b32.xlu1 %v2396_v7, %s2202_s13 }
 0x33f   : > { %946 = vrot.lane.b32.xlu1 %v2406_v9, %s2202_s13 }
 0x3ab   : > { %v875_v56 = vpop.xlane.xlu1 %874 }
 0x3ac   : > { %v879_v57 = vsub.f32 %v871_v49, %v875_v56 }
 0x3ae   : > { %v881_v58 = vmul.f32 1.442695, %v879_v57 }
 0x3af   : > { %v878_v59 = vpop.xlane.xlu0 %877  ;;  %v899_v2 = vpop.permute.xlu1 %898 }
 0x3b0   : > { %2084 = vpow2.f32 %v881_v58  ;;  %v880_v60 = vsub.f32 %v872_v53, %v878_v59  ;;  %1897 = vmatpush3.bf16.msra.mxu0 %v899_v2 }
 0x3b1   : > { %1898 = vmatprep.subr.bf16.mxu0 %v2199_v5 }
 0x3b2   : > { %v883_v61 = vmul.f32 1.442695, %v880_v60 }
 0x3b3   : > { %v951_v13 = vpop.permute.xlu1 %950 }
 0x3b4   : > { %2086 = vpow2.f32 %v883_v61  ;;  %v959_v16 = vsel %vm681_vm0, %v951_v13, 0 }
 0x3b7   : > { %v949_v18 = vpop.permute.xlu1 %948 }
 0x3b8   : > { %v956_v19 = vsel %vm681_vm0, %v949_v18, 0 }
 0x3bb   : > { %v947_v20 = vpop.permute.xlu1 %946 }
 0x3bd   : > { %v2085_v62 = vpop.eup %2084 }
 0x3be   : > { %v885_v63 = vsel %vm735_vm3, %v2085_v62, 0.0 }
 0x3bf   : > { %886 = vadd.xlane.f32.xlu0 %v885_v63 }
 0x3c1   : > { %v2087_v0 = vpop.eup %2086 }
 0x3c2   : > { %v888_v1 = vsel %vm735_vm3, %v2087_v0, 0.0 }
 0x3c3   : > { %889 = vadd.xlane.f32.xlu0 %v888_v1 }
 0x3d9   : > { %896 = vrot.lane.b32.xlu0 %v2430_v31, %s2201_s22 }
 0x448   : > { %v887_v3 = vpop.xlane.xlu0 %886 }
 0x449   : > { %2088 = vrcp.f32 %v887_v3 }
 0x44c   : > { %v890_v6 = vpop.xlane.xlu0 %889 }
 0x44d   : > { %2090 = vrcp.f32 %v890_v6 }
 0x450   : > { %v897_v8 = vpop.permute.xlu0 %896 }
 0x451   : > { %1899 = vmatpush3.bf16.msra.mxu0 %v897_v8 }
 0x452   : > { %1904 = vmatprep.subr.bf16.mxu0 %v2199_v5 }
 0x456   : > { %v2089_v10 = vpop.eup %2088 }
 0x457   : > { %v892_v14 = vmul.f32 %v2089_v10, %v2085_v62 }
 0x45a   : > { %v2091_v12 = vpop.eup %2090 }
 0x45b   : > { %v894_v15 = vmul.f32 %v2091_v12, %v2087_v0 }
 0x45d   : > { %v895_v17 = vpack.c.bf16 %v894_v15, %v892_v14 }
 0x45f   : > { %1901 = vmatmul.mubr.msk.bf16.vlgmr.msra.gmra.mxu0 %vm735_vm3, %v895_v17 }
 0x460   : > { %1905 = vmatpush3.bf16.xpose.msra.mxu0 %v959_v16  ;;  %1908 = vmatprep.mubr.msk.bf16.mxu0 %vm2200_vm1, %v2199_v5 }
 0x461   : > { %1906 = vmatprep.subr.bf16.mxu0 %v2199_v5 }
 0x468   : > { %1907 = vmatpush3.bf16.xpose.msra.mxu0 %v956_v19 }
 0x469   : > { %1928 = vmatprep.subr.bf16.mxu0 %v2199_v5 }
 0x46f   : > { %1909 = vmatmul.mubr.msk.bf16.vlgmr.msra.gmra.mxu0 %vm681_vm0, %v947_v20 }
 0x470   : > { %1932 = vmatprep.mubr.msk.bf16.mxu0 %vm2200_vm1, %v2199_v5 }
 0x51f   : > { %v2483_v21 = vpop.f32.mrf.mxu0 }
 0x521   : > { %v1902_v22 = vpop.f32.mrf.mxu0 }
 0x523   : > { %v2485_v23 = vpop.f32.mrf.mxu0 }
 0x524   : > { %v2054_v24 = vpack.i.bf16 %v2485_v23, %v2483_v21 }
 0x525   : > { %v1903_v25 = vpop.f32.mrf.mxu0 }
 0x52f   : > { %v995_v26 = vpop.f32.mrf.mxu0 }
 0x530   : > { %v1002_v27 = vsel %vm732_vm2, %v995_v26, -1e+30 }
 0x531   : > { %v1910_v28 = vpop.f32.mrf.mxu0  ;;  %v1004_v29 = vsel %vm735_vm3, %v1002_v27, -inf }
 0x532   : > { %1005 = vmax.xlane.f32.xlu0 %v1004_v29 }
 0x533   : > { %v998_v32 = vpop.f32.mrf.mxu0 }
 0x534   : > { %v1003_v33 = vsel %vm732_vm2, %v998_v32, -1e+30  ;;  %v2075_v32 = vld [vmem:[%s2624_s4] sm:$0xff]  }
 0x535   : > { %v1911_v34 = vpop.f32.mrf.mxu0  ;;  %v1007_v35 = vsel %vm735_vm3, %v1003_v33, -inf }
 0x536   : > { %1008 = vmax.xlane.f32.xlu1 %v1007_v35 }
 0x547   : > { %1027 = vrot.lane.b32.xlu1 %v2430_v31, %s2202_s13 }
 0x54b   : > { %1081 = vrot.lane.b32.xlu1 %v2390_v4, %s2203_s14 }
 0x54f   : > { %1079 = vrot.lane.b32.xlu1 %v2396_v7, %s2203_s14 }
 0x5bb   : > { %v1006_v36 = vpop.xlane.xlu0 %1005 }
 0x5bc   : > { %v1010_v37 = vsub.f32 %v1002_v27, %v1006_v36 }
 0x5be   : > { %v1012_v38 = vmul.f32 1.442695, %v1010_v37 }
 0x5bf   : > { %v1009_v39 = vpop.xlane.xlu1 %1008 }
 0x5c0   : > { %2092 = vpow2.f32 %v1012_v38  ;;  %v1011_v40 = vsub.f32 %v1003_v33, %v1009_v39 }
 0x5c2   : > { %v1014_v41 = vmul.f32 1.442695, %v1011_v40 }
 0x5c3   : > { %v1028_v49 = vpop.permute.xlu1 %1027 }
 0x5c4   : > { %2094 = vpow2.f32 %v1014_v41 }
 0x5c7   : > { %v1082_v52 = vpop.permute.xlu1 %1081 }
 0x5c8   : > { %v1090_v55 = vsel %vm681_vm0, %v1082_v52, 0 }
 0x5cb   : > { %v1080_v56 = vpop.permute.xlu1 %1079 }
 0x5cc   : > { %v1087_v57 = vsel %vm681_vm0, %v1080_v56, 0 }
 0x5cd   : > { %v2093_v42 = vpop.eup %2092 }
 0x5ce   : > { %v1016_v43 = vsel %vm735_vm3, %v2093_v42, 0.0 }
 0x5cf   : > { %1017 = vadd.xlane.f32.xlu0 %v1016_v43 }
 0x5d1   : > { %v2095_v45 = vpop.eup %2094 }
 0x5d2   : > { %v1019_v47 = vsel %vm735_vm3, %v2095_v45, 0.0 }
 0x5d3   : > { %1020 = vadd.xlane.f32.xlu0 %v1019_v47 }
 0x5e9   : > { %1029 = vrot.lane.b32.xlu0 %v2426_v30, %s2202_s13 }
 0x5ed   : > { %1077 = vrot.lane.b32.xlu0 %v2406_v9, %s2203_s14 }
 0x658   : > { %v1018_v4 = vpop.xlane.xlu0 %1017 }
 0x659   : > { %2096 = vrcp.f32 %v1018_v4 }
 0x65c   : > { %v1021_v7 = vpop.xlane.xlu0 %1020 }
 0x65d   : > { %2098 = vrcp.f32 %v1021_v7 }
 0x660   : > { %v1030_v48 = vpop.permute.xlu0 %1029 }
 0x661   : > { %1913 = vmatpush3.bf16.msra.mxu1 %v1030_v48 }
 0x662   : > { %1914 = vmatprep.subr.bf16.mxu1 %v2199_v5 }
 0x664   : > { %v1078_v58 = vpop.permute.xlu0 %1077 }
 0x665   : > { %1915 = vmatpush3.bf16.msra.mxu1 %v1028_v49 }
 0x666   : > { %1920 = vmatprep.subr.bf16.mxu1 %v2199_v5  ;;  %v2097_v50 = vpop.eup %2096 }
 0x667   : > { %v1023_v53 = vmul.f32 %v2097_v50, %v2093_v42 }
 0x66a   : > { %v2099_v51 = vpop.eup %2098 }
 0x66b   : > { %v1025_v54 = vmul.f32 %v2099_v51, %v2095_v45 }
 0x66d   : > { %v1026_v9 = vpack.c.bf16 %v1025_v54, %v1023_v53  ;;  %v1804_v53 = vld [vmem:[%s2625_s5] ss:$0 sm:$0xff] }
 0x66e   : > { %v652_v54 = vld [vmem:[%s2359_s30] sm:$0xff] }
 0x66f   : > { %1917 = vmatmul.mubr.msk.bf16.vlgmr.msra.gmra.mxu1 %vm735_vm3, %v1026_v9 }
 0x670   : > { %1921 = vmatpush3.bf16.xpose.msra.mxu1 %v1090_v55  ;;  %1924 = vmatprep.mubr.msk.bf16.mxu1 %vm2200_vm1, %v2199_v5 }
 0x671   : > { %1922 = vmatprep.subr.bf16.mxu1 %v2199_v5 }
 0x678   : > { %1923 = vmatpush3.bf16.xpose.msra.mxu1 %v1087_v57  ;;  %v653_v57 = vld [vmem:[%s2359_s30 + $0x8] sm:$0xff] }
 0x67f   : > { %1925 = vmatmul.mubr.msk.bf16.vlgmr.msra.gmra.mxu1 %vm681_vm0, %v1078_v58 }
 0x72f   : > { %v1070_v59 = vpop.f32.mrf.mxu1 }
 0x731   : > { %v1918_v60 = vpop.f32.mrf.mxu1 }
 0x733   : > { %v1073_v61 = vpop.f32.mrf.mxu1 }
 0x734   : > { %v2059_v12 = vpack.i.bf16 %v1073_v61, %v1070_v59 }
 0x735   : > { %v1919_v62 = vpop.f32.mrf.mxu1 }
 0x73f   : > { %v1126_v63 = vpop.f32.mrf.mxu1 }
 0x740   : > { %v1133_v0 = vsel %vm732_vm2, %v1126_v63, -1e+30 }
 0x741   : > { %v1926_v1 = vpop.f32.mrf.mxu1  ;;  %v1135_v2 = vsel %vm735_vm3, %v1133_v0, -inf }
 0x742   : > { %1136 = vmax.xlane.f32.xlu1 %v1135_v2 }
 0x743   : > { %v1129_v3 = vpop.f32.mrf.mxu1 }
 0x744   : > { %v1134_v6 = vsel %vm732_vm2, %v1129_v3, -1e+30 }
 0x745   : > { %v1927_v8 = vpop.f32.mrf.mxu1  ;;  %v1138_v10 = vsel %vm735_vm3, %v1134_v6, -inf }
 0x746   : > { %1139 = vmax.xlane.f32.xlu0 %v1138_v10 }
 0x753   : > { %1160 = vrot.lane.b32.xlu1 %v2426_v30, %s2203_s14 }
 0x757   : > { %2055 = vrot.lane.b32.xlu1 %v2054_v24, %s2204_s25 }
 0x75b   : > { %2060 = vrot.lane.b32.xlu1 %v2059_v12, %s2205_s8 }
 0x7cb   : > { %v1137_v13 = vpop.xlane.xlu1 %1136 }
 0x7cc   : > { %v1141_v14 = vsub.f32 %v1133_v0, %v1137_v13 }
 0x7ce   : > { %v1143_v15 = vmul.f32 1.442695, %v1141_v14 }
 0x7cf   : > { %v1161_v11 = vpop.permute.xlu1 %1160  ;;  %v1140_v16 = vpop.xlane.xlu0 %1139 }
 0x7d0   : > { %2100 = vpow2.f32 %v1143_v15  ;;  %v1142_v17 = vsub.f32 %v1134_v6, %v1140_v16  ;;  %1929 = vmatpush3.bf16.msra.mxu0 %v1161_v11 }
 0x7d1   : > { %1930 = vmatprep.subr.bf16.mxu0 %v2199_v5 }
 0x7d2   : > { %v1145_v18 = vmul.f32 1.442695, %v1142_v17 }
 0x7d3   : > { %v2056_v38 = vpop.permute.xlu1 %2055 }
 0x7d4   : > { %2102 = vpow2.f32 %v1145_v18  ;;  %v2058_v40 = vunpack.i.h.bf16 %v2056_v38  ;;  %v2057_v41 = vunpack.i.l.bf16 %v2056_v38 }
 0x7d6   : > { %v1233_v45 = vsel %vm681_vm0, %v2451_v46, %v2058_v40  ;;  %v1232_v47 = vsel %vm681_vm0, %v2449_v44, %v2057_v41  ;;  %v1812_v44 = vld [vmem:[%s2631_s11] ss:$0 sm:$0xff] }
 0x7d7   : > { %v2061_v39 = vpop.permute.xlu1 %2060 }
 0x7d8   : > { %v2063_v42 = vunpack.i.h.bf16 %v2061_v39  ;;  %v2062_v43 = vunpack.i.l.bf16 %v2061_v39 }
 0x7da   : > { %v1235_v48 = vsel %vm1234_vm4, %v1232_v47, %v2062_v43  ;;  %v1236_v49 = vsel %vm1234_vm4, %v1233_v45, %v2063_v42 }
 0x7dd   : > { %v2101_v30 = vpop.eup %2100 }
 0x7de   : > { %v1147_v19 = vsel %vm735_vm3, %v2101_v30, 0.0 }
 0x7df   : > { %1148 = vadd.xlane.f32.xlu0 %v1147_v19 }
 0x7e1   : > { %v2103_v20 = vpop.eup %2102 }
 0x7e2   : > { %v1150_v21 = vsel %vm735_vm3, %v2103_v20, 0.0 }
 0x7e3   : > { %1151 = vadd.xlane.f32.xlu0 %v1150_v21 }
 0x7f9   : > { %1158 = vrot.lane.b32.xlu0 %v2430_v31, %s2203_s14  ;;  %v2074_v31 = vld [vmem:[%s2624_s4 + $0x8] sm:$0xff]  }
 0x868   : > { %v1149_v22 = vpop.xlane.xlu0 %1148 }
 0x869   : > { %2104 = vrcp.f32 %v1149_v22  ;;  %v1808_v22 = vld [vmem:[%s2626_s6] ss:$0 sm:$0xff] }
 0x86c   : > { %v1152_v23 = vpop.xlane.xlu0 %1151 }
 0x86d   : > { %2106 = vrcp.f32 %v1152_v23 }
 0x870   : > { %v1159_v24 = vpop.permute.xlu0 %1158 }
 0x871   : > { %1931 = vmatpush3.bf16.msra.mxu0 %v1159_v24  ;;  %v1809_v24 = vld [vmem:[%s2651_s18] ss:$0 sm:$0xff] }
 0x872   : > { %1936 = vmatprep.subr.bf16.mxu0 %v2199_v5 }
 0x876   : > { %v2105_v25 = vpop.eup %2104 }
 0x877   : > { %v1154_v27 = vmul.f32 %v2105_v25, %v2101_v30 }
 0x87a   : > { %v2107_v26 = vpop.eup %2106 }
 0x87b   : > { %v1156_v28 = vmul.f32 %v2107_v26, %v2103_v20 }
 0x87d   : > { %v1157_v29 = vpack.c.bf16 %v1156_v28, %v1154_v27 }
 0x87f   : > { %1933 = vmatmul.mubr.msk.bf16.vlgmr.msra.gmra.mxu0 %vm735_vm3, %v1157_v29 }
 0x880   : > { %1940 = vmatprep.mubr.msk.bf16.mxu0 %vm2200_vm1, %v2199_v5  ;;  %1937 = vmatpush3.bf16.msra.mxu0 %v2074_v31 }
 0x881   : > { %1938 = vmatprep.subr.bf16.mxu0 %v2199_v5 }
 0x884   : > { %1939 = vmatpush3.bf16.msra.mxu0 %v2075_v32 }
 0x93f   : > { %v1201_v33 = vpop.f32.mrf.mxu0 }
 0x941   : > { %v1934_v34 = vpop.f32.mrf.mxu0 }
 0x943   : > { %v1204_v35 = vpop.f32.mrf.mxu0 }
 0x944   : > { %v2064_v36 = vpack.i.bf16 %v1204_v35, %v1201_v33 }
 0x945   : > { %v1935_v37 = vpop.f32.mrf.mxu0 }
 0x946   : > { %2065 = vrot.lane.b32.xlu1 %v2064_v36, %s2206_s17 }
 0x9b8   : > { %v2066_v5 = vpop.permute.xlu1 %2065 }
 0x9b9   : > { %v2068_v4 = vunpack.i.h.bf16 %v2066_v5  ;;  %v2067_v7 = vunpack.i.l.bf16 %v2066_v5 }
 0x9bb   : > { %v1239_v50 = vsel %vm1237_vm5, %v1236_v49, %v2068_v4  ;;  %v1238_v51 = vsel %vm1237_vm5, %v1235_v48, %v2067_v7 }
 0x9bc   : > { %v1240_v52 = vpack.c.bf16 %v1239_v50, %v1238_v51 }
 0x9be   : > { %1941 = vmatmul.mubr.msk.bf16.vlgmr.msra.gmra.mxu0 %vm735_vm3, %v1240_v52 }
 0xa7e   : > { %v1301_v55 = vpop.f32.mrf.mxu0 }
 0xa7f   : > { %v1302_v46 = vadd.f32 %v1804_v53, %v1301_v55 }
 0xa80   : > { %v1942_v9 = vpop.f32.mrf.mxu0 }
 0xa81   : > { %v1308_v56 = vadd.f32 %v1302_v46, %v652_v54 }
 0xa82   : > { %v1304_v58 = vpop.f32.mrf.mxu0 }
 0xa83   : > { %v1373_v59 = vadd.f32 %v1812_v44, %v1308_v56  ;;  %v1305_v60 = vadd.f32 %v1804_v53, %v1304_v58  ;;  %v1312_v61 = vsel %vm735_vm3, %v1308_v56, 0.0 }
 0xa84   : > { %v1943_v62 = vpop.f32.mrf.mxu0  ;;  %1313 = vadd.xlane.f32.xlu0 %v1312_v61 }
 0xa85   : > { %1375 = vst.msk [vmem:[#allocation3] sm:$0xff] %vm735_vm3, %v1373_v59  ;;  %v1309_v63 = vadd.f32 %v1305_v60, %v653_v57 }
 0xa87   : > { %v1374_v0 = vadd.f32 %v1812_v44, %v1309_v63  ;;  %v1315_v1 = vsel %vm735_vm3, %v1309_v63, 0.0 }
 0xa88   : > { %1316 = vadd.xlane.f32.xlu1 %v1315_v1 }
 0xa89   : > { %1376 = vst.msk [vmem:[#allocation3 + $0x8] sm:$0xff] %vm735_vm3, %v1374_v0 }
 0xb0d   : > { %v1314_v2 = vpop.xlane.xlu0 %1313 }
 0xb0e   : > { %v1319_v3 = vmul.f32 0.03125, %v1314_v2 }
 0xb10   : > { %v1321_v6 = vsub.f32 %v1308_v56, %v1319_v3 }
 0xb11   : > { %v1317_v8 = vpop.xlane.xlu1 %1316 }
 0xb12   : > { %v1320_v10 = vmul.f32 0.03125, %v1317_v8  ;;  %v1323_v12 = vmul.f32 %v1321_v6, %v1321_v6 }
 0xb14   : > { %v1322_v13 = vsub.f32 %v1309_v63, %v1320_v10  ;;  %v1325_v14 = vsel %vm735_vm3, %v1323_v12, 0.0 }
 0xb15   : > { %1326 = vadd.xlane.f32.xlu0 %v1325_v14 }
 0xb16   : > { %v1324_v15 = vmul.f32 %v1322_v13, %v1322_v13 }
 0xb18   : > { %v1328_v11 = vsel %vm735_vm3, %v1324_v15, 0.0 }
 0xb19   : > { %1329 = vadd.xlane.f32.xlu0 %v1328_v11 }
 0xb9e   : > { %v1327_v16 = vpop.xlane.xlu0 %1326 }
 0xb9f   : > { %v1331_v17 = vmul.f32 0.03125, %v1327_v16 }
 0xba1   : > { %v1333_v18 = vadd.f32 2e-06, %v1331_v17 }
 0xba2   : > { %v1330_v30 = vpop.xlane.xlu0 %1329 }
 0xba3   : > { %2108 = vrsqrt.f32 %v1333_v18  ;;  %v1332_v19 = vmul.f32 0.03125, %v1330_v30 }
 0xba5   : > { %v1334_v20 = vadd.f32 2e-06, %v1332_v19 }
 0xba7   : > { %2110 = vrsqrt.f32 %v1334_v20 }
 0xbb0   : > { %v2109_v21 = vpop.eup %2108 }
 0xbb1   : > { %v1337_v23 = vmul.f32 %v2109_v21, %v1321_v6 }
 0xbb3   : > { %v1345_v25 = vmul.f32 %v1808_v22, %v1337_v23 }
 0xbb4   : > { %v2111_v26 = vpop.eup %2110 }
 0xbb5   : > { %v1353_v27 = vadd.f32 %v1809_v24, %v1345_v25  ;;  %v1338_v28 = vmul.f32 %v2111_v26, %v1322_v13 }
 0xbb7   : > { %v1831_v29 = vpack.c.bf16 %v1353_v27, %v1353_v27  ;;  %v1346_v31 = vmul.f32 %v1808_v22, %v1338_v28 }
 0xbb9   : > { %1364 = vst.msk [vmem:[#allocation2] sm:$0xf] %vm1363_vm6, %v1831_v29  ;;  %v1354_v32 = vadd.f32 %v1809_v24, %v1346_v31 }
 0xbbb   : > { %v1832_v33 = vpack.c.bf16 %v1354_v32, %v1354_v32 }
 0xbbd   : > { %1365 = vst.msk [vmem:[#allocation2 + $0x4] sm:$0xf] %vm1363_vm6, %v1832_v33 }
 0xbbe PF: > { %v2112_v34 = vld [vmem:[%s519_s21 + $0x8] sm:$0xff]   ;;  %v2207_v35 = vmov 0.0   ;;  %v2113_v36 = vld [vmem:[%s519_s21] sm:$0xff]   ;;  %vm2208_vm7 = vmmov 0   ;;  %vm1407_vm8 = vcmask 261120   ;;  %p1826_p2 = scmp.ne.s32.totalorder %s2173_s23, 1 }
 0xbbf   : > { %1944 = vmatprep.subr.bf16.mxu0 %v2207_v35  ;;  %1952 = vmatprep.subr.bf16.mxu1 %v2207_v35  ;;  %v2115_v38 = vld [vmem:[%s2386_s20 + $0x38] sm:$0xff]   ;;  %v2116_v39 = vld [vmem:[%s2386_s20 + $0x30] sm:$0xff]   ;;  %v2117_v40 = vld [vmem:[%s2386_s20 + $0x28] sm:$0xff]  }
 0xbc0   : > { %1945 = vmatpush3.bf16.msra.mxu0 %v2112_v34  ;;  %1948 = vmatprep.mubr.msk.bf16.mxu0 %vm2208_vm7, %v2207_v35  ;;  %v2118_v41 = vld [vmem:[%s2386_s20 + $0x20] sm:$0xff]   ;;  %v2119_v42 = vld [vmem:[%s2386_s20 + $0x18] sm:$0xff]   ;;  %v2120_v43 = vld [vmem:[%s2386_s20 + $0x10] sm:$0xff]  }
 0xbc1   : > { %1946 = vmatprep.subr.bf16.mxu0 %v2207_v35  ;;  %1968 = vmatprep.mubr.msk.bf16.mxu1 %vm2208_vm7, %v2207_v35  ;;  %v2121_v5 = vld [vmem:[%s2386_s20 + $0x8] sm:$0xff]   ;;  %v2122_v45 = vld [vmem:[%s2386_s20] sm:$0xff]   ;;  %v1472_v13 = vld [vmem:[#allocation3 + $0x8] sm:$0xff] }
 0xbc2   : > { %1953 = vmatpush3.bf16.msra.mxu1 %v2115_v38  ;;  %v1813_v47 = vld [vmem:[%s630_s26] ss:$0 sm:$0xff]  ;;  %v1471_v6 = vld [vmem:[#allocation3] sm:$0xff] }
 0xbc3   : > { %1954 = vmatprep.subr.bf16.mxu1 %v2207_v35 }
 0xbc4   : > { %v2114_v37 = vld [vmem:[#allocation2] sm:$0xff]   ;;  %1947 = vmatpush3.bf16.msra.mxu0 %v2113_v36 }
 0xbc6   : > { %1955 = vmatpush3.bf16.msra.mxu1 %v2116_v39 }
 0xbc7   : > { %1949 = vmatmul.mubr.msk.bf16.vlgmr.msra.gmra.mxu0 %vm1407_vm8, %v2114_v37  ;;  %1956 = vmatprep.subr.bf16.mxu1 %v2207_v35 }
 0xbca   : > { %1957 = vmatpush3.bf16.msra.mxu1 %v2117_v40 }
 0xbcb   : > { %1958 = vmatprep.subr.bf16.mxu1 %v2207_v35 }
 0xbce   : > { %1959 = vmatpush3.bf16.msra.mxu1 %v2118_v41 }
 0xbcf   : > { %1960 = vmatprep.subr.bf16.mxu1 %v2207_v35 }
 0xbd2   : > { %1961 = vmatpush3.bf16.msra.mxu1 %v2119_v42 }
 0xbd3   : > { %1962 = vmatprep.subr.bf16.mxu1 %v2207_v35 }
 0xbd6   : > { %1963 = vmatpush3.bf16.msra.mxu1 %v2120_v43 }
 0xbd7   : > { %1964 = vmatprep.subr.bf16.mxu1 %v2207_v35 }
 0xbda   : > { %1965 = vmatpush3.bf16.msra.mxu1 %v2121_v5 }
 0xbdb   : > { %1966 = vmatprep.subr.bf16.mxu1 %v2207_v35 }
 0xbde   : > { %1967 = vmatpush3.bf16.msra.mxu1 %v2122_v45 }
 0xc87   : > { %v1445_v4 = vpop.f32.mrf.mxu0 }
 0xc88   : > { %v1446_v7 = vadd.f32 %v1813_v47, %v1445_v4 }
 0xc89   : > { %v1950_v48 = vpop.f32.mrf.mxu0 }
 0xc8a   : > { %v1454_v49 = vmul.f32 0.044715, %v1446_v7  ;;  %v1452_v62 = vmul.f32 0.5, %v1446_v7 }
 0xc8b   : > { %v1448_v50 = vpop.f32.mrf.mxu0 }
 0xc8c   : > { %v1456_v51 = vmul.f32 %v1454_v49, %v1446_v7  ;;  %v1449_v52 = vadd.f32 %v1813_v47, %v1448_v50 }
 0xc8d   : > { %v1951_v53 = vpop.f32.mrf.mxu0 }
 0xc8e   : > { %v1458_v54 = vmul.f32 %v1456_v51, %v1446_v7  ;;  %v1455_v55 = vmul.f32 0.044715, %v1449_v52  ;;  %v1453_v63 = vmul.f32 0.5, %v1449_v52 }
 0xc90   : > { %v1457_v46 = vmul.f32 %v1455_v55, %v1449_v52  ;;  %v1460_v44 = vadd.f32 %v1458_v54, %v1446_v7 }
 0xc92   : > { %v1459_v9 = vmul.f32 %v1457_v46, %v1449_v52  ;;  %v1462_v56 = vmul.f32 0.7978846, %v1460_v44 }
 0xc94   : > { %v1461_v57 = vadd.f32 %v1459_v9, %v1449_v52  ;;  %2123 = vtanh.f32 %v1462_v56 }
 0xc96   : > { %v1463_v58 = vmul.f32 0.7978846, %v1461_v57 }
 0xc98   : > { %2125 = vtanh.f32 %v1463_v58 }
 0xca1   : > { %v2124_v59 = vpop.eup %2123 }
 0xca2   : > { %v1466_v60 = vadd.f32 1.0, %v2124_v59 }
 0xca4   : > { %v1468_v1 = vmul.f32 %v1466_v60, %v1452_v62 }
 0xca5   : > { %v2126_v61 = vpop.eup %2125 }
 0xca6   : > { %v1467_v0 = vadd.f32 1.0, %v2126_v61 }
 0xca8   : > { %v1469_v2 = vmul.f32 %v1467_v0, %v1453_v63 }
 0xcaa   : > { %v1470_v3 = vpack.c.bf16 %v1469_v2, %v1468_v1 }
 0xcac   : > { %1969 = vmatmul.mubr.bf16.vlgmr.msra.gmra.mxu1 %v1470_v3 }
 0xd6c   : > { %v1571_v8 = vpop.f32.mrf.mxu1 }
 0xd6d   : > { %v1578_v10 = vadd.f32 %v1571_v8, %v1471_v6 }
 0xd6e   : > { %v1970_v12 = vpop.f32.mrf.mxu1 }
 0xd6f   : > { %1580 = vst.msk [vmem:[#allocation3] sm:$0xff] %vm1407_vm8, %v1578_v10  ;;  %1585 = sbr.rel (%p1826_p2) target bundleno = 3452 (0xd7c), region = 117 }
 0xd70   : > { %v1574_v14 = vpop.f32.mrf.mxu1 }
 0xd71   : > { %v1579_v15 = vadd.f32 %v1574_v14, %v1472_v13 }
 0xd72   : > { %v1971_v11 = vpop.f32.mrf.mxu1 }
 0xd73   : > { %1581 = vst.msk [vmem:[#allocation3 + $0x8] sm:$0xff] %vm1407_vm8, %v1579_v15 }
 0xd76   : > { %v1586_v16 = vld [vmem:[#allocation3] sm:$0xff] }
 0xd77   : > { %1588 = vst.msk [vmem:[%s2374_s15] sm:$0xff] %vm1407_vm8, %v1586_v16 }
 0xd7a   : > { %v1587_v17 = vld [vmem:[#allocation3 + $0x8] sm:$0xff] }
 0xd7b   : > { %1589 = vst.msk [vmem:[%s2374_s15 + $0x8] sm:$0xff] %vm1407_vm8, %v1587_v17 }
 0xd7c PF: > { %s2652_s16 = sld [smem:[#allocation9_spill]] }
 0xd7d   : > { %s2653_s21 = sld [smem:[#allocation5_spill]] }
 0xd7e   : > { %s2654_s22 = sld [smem:[#allocation12_spill]] }
 0xd7f   : > { %s2655_s23 = sld [smem:[#allocation6_spill]] }
 0xd80   : > { %s2656_s24 = sld [smem:[#allocation7_spill]] }
 0xd81   : > { %s2657_s25 = sld [smem:[#allocation8_spill]] }
 0xd82   : > { %s22_s29 = sadd.s32 1, %s2652_s16   ;;  %s2658_s26 = sld [smem:[#allocation10_spill]] }
 0xd83   : > { %p19_p3 = scmp.ge.s32.totalorder %s22_s29, 10   ;;  %s2659_s27 = sld [smem:[#allocation11_spill]] }
 0xd84   : > { %s2660_s28 = sld [smem:[#allocation13_spill]] }
 0xd85   :  { %21 = sbr.rel (!%p19_p3) target bundleno = 8 (0x8), region = 170 }

</bundles_post_ra>
